<compile_context>
chip_gen: v5e
topology: v5e:2x2
jax: 0.10.0
libtpu: 0.0.40
codegen_flags: <defaults>
</compile_context>

<pallas_src>
import functools

import numpy as np

import jax
import jax.numpy as jnp
from jax.experimental import pallas as pl
from jax.experimental.pallas import tpu as pltpu


def scconv_kernel(x_ref, gnb_ref, wg_ref, gbc_ref, gbcw_ref, gag_ref,
                  sq_ref, gwcp_ref, gwcc_ref, gwcn_ref, gwcb_ref, pwc2_ref,
                  pool_ref, bcast_ref, edge_ref, o_ref,
                  *, group_num, gate_treshold, up_sq, low_sq, seq_len, eps):
    f32 = jnp.float32
    bf16 = jnp.bfloat16

    x = x_ref[...]                           # (C, B*L) f32, lanes batch-major
    C = x.shape[0]
    n = (C // group_num) * seq_len           # elems per (group, batch) stat set

    pool = pool_ref[...]                     # (B*L, B)  sums lanes per batch
    bcast = bcast_ref[...]                   # (B, B*L)  batch value -> lanes
    gbc = gbc_ref[...]                       # (C, G)    group value -> channels
    gag = gag_ref[...]                       # (G, C)    channels -> group sum

    # ---------------- SRU: GroupBatchnorm1d (per batch, per group) ----------
    lane_sum = jnp.dot(x, pool, preferred_element_type=f32)            # (C, B)
    mean_gb = jnp.dot(gag, lane_sum, preferred_element_type=f32) * (1.0 / n)
    mean_full = jnp.dot(gbc,
                        jnp.dot(mean_gb, bcast, preferred_element_type=f32),
                        preferred_element_type=f32)                    # (C, B*L)
    cent = x - mean_full
    var_gb = jnp.dot(gag,
                     jnp.dot(cent * cent, pool, preferred_element_type=f32),
                     preferred_element_type=f32) * (1.0 / (n - 1))     # ddof=1
    # Tiny (G, B) operand: exact reciprocal for parity with the torch reference.
    inv_gb = 1.0 / (jnp.sqrt(var_gb) + eps)                            # (G, B)
    # gn weight folded into the broadcast matrix: gbcw[c,g] = gn_w[c]*[grp(c)==g].
    inv_full_w = jnp.dot(gbcw_ref[...],
                         jnp.dot(inv_gb, bcast, preferred_element_type=f32),
                         preferred_element_type=f32)                   # (C, B*L)
    gn = cent * inv_full_w + gnb_ref[...]                              # (C, B*L)

    # ---------------- SRU: gating + reconstruct -----------------------------
    rw = jax.nn.sigmoid(gn * wg_ref[...])
    x1 = jnp.where(rw >= gate_treshold, gn, 0.0)     # info part
    x2 = gn - x1                                     # non-info part (complement)
    half = C // 2
    sru = x1 + pltpu.roll(x2, shift=half, axis=0)    # (C, B*L), sublane roll

    # ---------------- CRU ----------------------------------------------------
    # Fused block-diagonal squeeze1/squeeze2 (k=1 convs), bf16 on the MXU.
    # TODO(synk): for large C (MXU-bound regime on v5e) split this into two
    # half-K matmuls (sq1 @ sru[:up_ch], sq2 @ sru[up_ch:]) to skip the zeros.
    sq = jnp.dot(sq_ref[...], sru.astype(bf16),
                 preferred_element_type=f32)         # (up_sq + low_sq, B*L)
    u = sq[:up_sq]                                   # squeezed "up" channels
    low = sq[up_sq:]                                 # squeezed "low" channels

    # GWC(k=3, grouped) + PWC1 (folded into the center tap) as three per-tap
    # bf16 matmuls accumulated in f32 — no (3*up_sq, B*L) concat materialized.
    edge = edge_ref[...]
    not_first = edge[0:1, :]                         # 0 at l == 0 within a batch
    not_last = edge[1:2, :]                          # 0 at l == L-1
    bl = u.shape[1]
    u_bf = u.astype(bf16)
    prev_bf = (pltpu.roll(u, shift=1, axis=1) * not_first).astype(bf16)
    next_bf = (pltpu.roll(u, shift=bl - 1, axis=1) * not_last).astype(bf16)
    Y1 = (jnp.dot(gwcc_ref[...], u_bf, preferred_element_type=f32)
          + jnp.dot(gwcp_ref[...], prev_bf, preferred_element_type=f32)
          + jnp.dot(gwcn_ref[...], next_bf, preferred_element_type=f32)
          + gwcb_ref[...])                                           # (C, B*L)
    # Y2 = [PWC2(low); low] is never materialized; keep the two slabs separate.
    y2a = jnp.dot(pwc2_ref[...], low.astype(bf16),
                  preferred_element_type=f32)                        # (C-low_sq, B*L)

    # Channel attention: softmax over the pooled (2C, B) vector only.
    inv_len = 1.0 / seq_len
    p1 = jnp.dot(Y1, pool, preferred_element_type=f32) * inv_len     # (C, B)
    p2a = jnp.dot(y2a, pool, preferred_element_type=f32) * inv_len
    p2b = jnp.dot(low, pool, preferred_element_type=f32) * inv_len
    pooled = jnp.concatenate([p1, p2a, p2b], axis=0)                 # (2C, B)
    pmax = jnp.max(pooled, axis=0, keepdims=True)
    e = jnp.exp(pooled - pmax)
    sm = e / jnp.sum(e, axis=0, keepdims=True)       # tiny (2C, B): exact divide
    s = jnp.dot(sm, bcast, preferred_element_type=f32)               # (2C, B*L)

    cl = C - low_sq
    t = s[:C] * Y1                                                   # (C, B*L)
    # Output written as two sublane slabs (out = sm1*Y1 + sm2*[y2a; low]).
    o_ref[:cl, :] = t[:cl] + s[C:C + cl] * y2a
    o_ref[cl:, :] = t[cl:] + s[C + cl:] * low


def init_scconv_params(key, op_channel, *, alpha=0.5, squeeze_radio=2,
                       group_size=2):
    up_ch = int(alpha * op_channel)
    low_ch = op_channel - up_ch
    up_sq = up_ch // squeeze_radio
    low_sq = low_ch // squeeze_radio
    ks = jax.random.split(key, 7)
    gn_w = jax.random.normal(ks[0], (op_channel, 1), jnp.float32)   # torch.randn
    gn_b = jnp.zeros((op_channel, 1), jnp.float32)
    sq1 = 0.1 * jax.random.normal(ks[1], (up_sq, up_ch), jnp.float32)
    sq2 = 0.1 * jax.random.normal(ks[2], (low_sq, low_ch), jnp.float32)
    gwc_w = 0.1 * jax.random.normal(ks[3], (op_channel, up_sq // group_size, 3),
                                    jnp.float32)
    gwc_b = 0.1 * jax.random.normal(ks[4], (op_channel, 1), jnp.float32)
    pwc1 = 0.1 * jax.random.normal(ks[5], (op_channel, up_sq), jnp.float32)
    pwc2 = 0.1 * jax.random.normal(ks[6], (op_channel - low_sq, low_sq),
                                   jnp.float32)

    # Fused block-diagonal squeeze: [squeeze1 0; 0 squeeze2] -> (up_sq+low_sq, C).
    sq_bd = np.zeros((up_sq + low_sq, op_channel), np.float32)
    sq_bd[:up_sq, :up_ch] = np.asarray(sq1)
    sq_bd[up_sq:, up_ch:] = np.asarray(sq2)

    # Dense (block-diagonal over groups) per-tap GWC weights; PWC1 folded into
    # the center tap.  Taps are kept separate so the kernel never materializes
    # a stacked (3*up_sq, B*L) operand.
    in_pg = up_sq // group_size
    out_pg = op_channel // group_size
    gwc_np = np.asarray(gwc_w)
    taps = np.zeros((3, op_channel, up_sq), np.float32)
    for o in range(op_channel):
        g = o // out_pg
        taps[:, o, g * in_pg:(g + 1) * in_pg] = gwc_np[o].T
    taps[1] += np.asarray(pwc1)

    return dict(gn_w=gn_w, gn_b=gn_b,
                sq_bd=jnp.asarray(sq_bd),
                gwc_prev=jnp.asarray(taps[0]),
                gwc_cent=jnp.asarray(taps[1]),
                gwc_next=jnp.asarray(taps[2]),
                gwc_b=gwc_b, pwc2=pwc2,
                up_channel=up_ch, low_channel=low_ch,
                up_sq=up_sq, low_sq=low_sq)


def _vmem_config():
    """Generation-aware (vmem_limit_bytes, per-tile working-set budget)."""
    try:
        cap = pltpu.get_tpu_info().vmem_capacity_bytes
    except Exception:
        cap = 64 << 20                       # unknown -> assume v7x-like core
    if cap >= (100 << 20):                   # v5e / v6e: 128 MiB physical VMEM
        return 96 << 20, 20 << 20
    return 44 << 20, 12 << 20                # v7x: 64 MiB physical, be conservative


def _choose_b_tile(n_batch, channels, length, bytes_budget):
    """Largest batch tile whose lane extent is 128-dense (or full batch) and
    whose working set (~14 live (C, L) f32 slabs per element, incl. the
    double-buffered in/out blocks) fits the budget.  Tiles that leave >= 2 grid
    steps are preferred so the "parallel" axis can shard across v7x's 2 TCs."""
    per_elem = channels * length * 4 * 14
    valid = [b for b in range(1, n_batch + 1)
             if n_batch % b == 0 and ((b * length) % 128 == 0 or b == n_batch)]
    multi = [b for b in valid if n_batch // b >= 2]
    cands = multi if multi else valid
    fitting = [b for b in cands if b * per_elem <= bytes_budget]
    if fitting:
        return max(fitting)
    # TODO(synk): add an L-tiled two-pass path (stats pass, then norm+conv with
    # a 1-element halo) for long sequences where even b_tile=1 overflows VMEM.
    return min(cands)


def scconv_forward(x, p, *, group_num=4, gate_treshold=0.5, eps=1e-10,
                   b_tile=None):
    N, C, L = x.shape
    vmem_limit, budget = _vmem_config()
    if b_tile is None:
        b_tile = _choose_b_tile(N, C, L, budget)
    assert N % b_tile == 0 and C % group_num == 0 and C % 2 == 0
    BL = b_tile * L
    cpg = C // group_num

    # Lane-fold: (N, C, L) -> (C, N*L), lanes ordered batch-major.
    x_t = jnp.transpose(x, (1, 0, 2)).reshape(C, N * L)

    # Exact divide for w_gamma (sum of randn gammas can be near zero).
    gn_w = p["gn_w"]
    w_gamma = gn_w / jnp.sum(gn_w)

    # Tiny constant matrices for per-batch pooling / broadcast on the MXU.
    lane_b = np.arange(BL) // L
    pool = (lane_b[:, None] == np.arange(b_tile)[None, :]).astype(np.float32)
    bcast = np.ascontiguousarray(pool.T)
    pos = np.arange(BL) % L
    edge = np.stack([(pos != 0), (pos != L - 1)]).astype(np.float32)  # (2, BL)
    ch = np.arange(C) // cpg
    gbc = (ch[:, None] == np.arange(group_num)[None, :]).astype(np.float32)
    gag = np.ascontiguousarray(gbc.T)
    # gn weight folded into the channel broadcast used for the inverse-std.
    gbc_w = gbc * np.asarray(gn_w)

    # bf16 conv weights (accumulation stays f32 in the MXU).
    sq_bd = p["sq_bd"].astype(jnp.bfloat16)
    gwc_p = p["gwc_prev"].astype(jnp.bfloat16)
    gwc_c = p["gwc_cent"].astype(jnp.bfloat16)
    gwc_n = p["gwc_next"].astype(jnp.bfloat16)
    pwc2 = p["pwc2"].astype(jnp.bfloat16)

    kernel = functools.partial(
        scconv_kernel, group_num=group_num, gate_treshold=gate_treshold,
        up_sq=p["up_sq"], low_sq=p["low_sq"], seq_len=L, eps=eps)

    params = [p["gn_b"], w_gamma,
              jnp.asarray(gbc), jnp.asarray(gbc_w), jnp.asarray(gag),
              sq_bd, gwc_p, gwc_c, gwc_n, p["gwc_b"], pwc2,
              jnp.asarray(pool), jnp.asarray(bcast), jnp.asarray(edge)]

    up_sq, low_sq = p["up_sq"], p["low_sq"]
    cost = pl.CostEstimate(
        flops=int(2 * N * L * (C * (up_sq + low_sq) + 3 * C * up_sq
                               + (C - low_sq) * low_sq + 8 * C)),
        transcendentals=int(2 * N * L * C),
        bytes_accessed=int(8 * C * N * L))

    def build(single_buffer_consts):
        def const_spec(shape):
            nd = len(shape)
            if single_buffer_consts:
                # Constant index_map is always (0,...): single-buffer to free VMEM.
                return pl.BlockSpec(shape, lambda i, _nd=nd: (0,) * _nd,
                                    pipeline_mode=pl.Buffered(1))
            return pl.BlockSpec(shape, lambda i, _nd=nd: (0,) * _nd)

        grid_spec = pltpu.PrefetchScalarGridSpec(
            num_scalar_prefetch=0,
            grid=(N // b_tile,),
            in_specs=[pl.BlockSpec((C, BL), lambda i: (0, i))]
                     + [const_spec(a.shape) for a in params],
            out_specs=pl.BlockSpec((C, BL), lambda i: (0, i)),
        )
        return pl.pallas_call(
            kernel,
            out_shape=jax.ShapeDtypeStruct((C, N * L), jnp.float32),
            grid_spec=grid_spec,
            compiler_params=pltpu.CompilerParams(
                dimension_semantics=("parallel",),       # megacore on v7x
                vmem_limit_bytes=vmem_limit),
            cost_estimate=cost,
        )

    try:
        y = build(True)(x_t, *params)
    except Exception:
        # pipeline_mode=pl.Buffered(1) not supported by this jax version:
        # fall back to default (double-buffered) constant specs.
        y = build(False)(x_t, *params)
    return jnp.transpose(y.reshape(C, N, L), (1, 0, 2))


if __name__ == "__main__":
    key = jax.random.PRNGKey(0)
    kx, kp = jax.random.split(key)
    N, C, L = 2, 8, 16                      # ScConv(op_channel=8), group_num=4
    x = jax.random.normal(kx, (N, C, L), jnp.float32)
    params = init_scconv_params(kp, C, alpha=0.5, squeeze_radio=2, group_size=2)
    out = scconv_forward(x, params, group_num=4, gate_treshold=0.5)
    jax.block_until_ready(out)
    assert out.shape == (N, C, L) and out.dtype == jnp.float32
    assert bool(jnp.all(jnp.isfinite(out)))
    print("KERNEL_OK")
</pallas_src>

<mosaic_0001>
module attributes {stable_mosaic.version = 11 : i64} {
  func.func @scconv_kernel(%arg0: i32, %arg1: memref<8x32xf32, #tpu.memory_space<vmem>>, %arg2: memref<8x1xf32, #tpu.memory_space<vmem>>, %arg3: memref<8x1xf32, #tpu.memory_space<vmem>>, %arg4: memref<8x4xf32, #tpu.memory_space<vmem>>, %arg5: memref<8x4xf32, #tpu.memory_space<vmem>>, %arg6: memref<4x8xf32, #tpu.memory_space<vmem>>, %arg7: memref<4x8xbf16, #tpu.memory_space<vmem>>, %arg8: memref<8x2xbf16, #tpu.memory_space<vmem>>, %arg9: memref<8x2xbf16, #tpu.memory_space<vmem>>, %arg10: memref<8x2xbf16, #tpu.memory_space<vmem>>, %arg11: memref<8x1xf32, #tpu.memory_space<vmem>>, %arg12: memref<6x2xbf16, #tpu.memory_space<vmem>>, %arg13: memref<32x2xf32, #tpu.memory_space<vmem>>, %arg14: memref<2x32xf32, #tpu.memory_space<vmem>>, %arg15: memref<2x32xf32, #tpu.memory_space<vmem>>, %arg16: memref<8x32xf32, #tpu.memory_space<vmem>>) attributes {dimension_semantics = [#tpu.dimension_semantics<parallel>], iteration_bounds = array<i64: 1>, scalar_prefetch = 0 : i64, scratch_operands = 0 : i64, tpu.core_type = #tpu.core_type<tc>, window_params = [{transform_indices = @transform_0, window_bounds = array<i64: 8, 32>}, {pipeline_mode = #tpu.pipeline_mode<synchronous>, transform_indices = @transform_1, window_bounds = array<i64: 8, 1>}, {pipeline_mode = #tpu.pipeline_mode<synchronous>, transform_indices = @transform_2, window_bounds = array<i64: 8, 1>}, {pipeline_mode = #tpu.pipeline_mode<synchronous>, transform_indices = @transform_3, window_bounds = array<i64: 8, 4>}, {pipeline_mode = #tpu.pipeline_mode<synchronous>, transform_indices = @transform_4, window_bounds = array<i64: 8, 4>}, {pipeline_mode = #tpu.pipeline_mode<synchronous>, transform_indices = @transform_5, window_bounds = array<i64: 4, 8>}, {pipeline_mode = #tpu.pipeline_mode<synchronous>, transform_indices = @transform_6, window_bounds = array<i64: 4, 8>}, {pipeline_mode = #tpu.pipeline_mode<synchronous>, transform_indices = @transform_7, window_bounds = array<i64: 8, 2>}, {pipeline_mode = #tpu.pipeline_mode<synchronous>, transform_indices = @transform_8, window_bounds = array<i64: 8, 2>}, {pipeline_mode = #tpu.pipeline_mode<synchronous>, transform_indices = @transform_9, window_bounds = array<i64: 8, 2>}, {pipeline_mode = #tpu.pipeline_mode<synchronous>, transform_indices = @transform_10, window_bounds = array<i64: 8, 1>}, {pipeline_mode = #tpu.pipeline_mode<synchronous>, transform_indices = @transform_11, window_bounds = array<i64: 6, 2>}, {pipeline_mode = #tpu.pipeline_mode<synchronous>, transform_indices = @transform_12, window_bounds = array<i64: 32, 2>}, {pipeline_mode = #tpu.pipeline_mode<synchronous>, transform_indices = @transform_13, window_bounds = array<i64: 2, 32>}, {pipeline_mode = #tpu.pipeline_mode<synchronous>, transform_indices = @transform_14, window_bounds = array<i64: 2, 32>}, {transform_indices = @transform_15, window_bounds = array<i64: 8, 32>}]} {
    %c0 = arith.constant 0 : index
    %c0_0 = arith.constant 0 : index
    %0 = vector.load %arg1[%c0, %c0_0] : memref<8x32xf32, #tpu.memory_space<vmem>>, vector<8x32xf32>
    %c0_1 = arith.constant 0 : index
    %c0_2 = arith.constant 0 : index
    %1 = vector.load %arg13[%c0_1, %c0_2] : memref<32x2xf32, #tpu.memory_space<vmem>>, vector<32x2xf32>
    %c0_3 = arith.constant 0 : index
    %c0_4 = arith.constant 0 : index
    %2 = vector.load %arg14[%c0_3, %c0_4] : memref<2x32xf32, #tpu.memory_space<vmem>>, vector<2x32xf32>
    %c0_5 = arith.constant 0 : index
    %c0_6 = arith.constant 0 : index
    %3 = vector.load %arg4[%c0_5, %c0_6] : memref<8x4xf32, #tpu.memory_space<vmem>>, vector<8x4xf32>
    %c0_7 = arith.constant 0 : index
    %c0_8 = arith.constant 0 : index
    %4 = vector.load %arg6[%c0_7, %c0_8] : memref<4x8xf32, #tpu.memory_space<vmem>>, vector<4x8xf32>
    %cst = arith.constant dense<0.000000e+00> : vector<8x2xf32>
    %5 = tpu.matmul %0, %1, %cst {dimension_numbers = #tpu.dot_dimension_numbers<[1], [0], [0], [1], [0, 0, 1, 1], [], []>} : vector<8x32xf32>, vector<32x2xf32>, vector<8x2xf32> -> vector<8x2xf32>
    %cst_9 = arith.constant dense<0.000000e+00> : vector<4x2xf32>
    %6 = tpu.matmul %4, %5, %cst_9 {dimension_numbers = #tpu.dot_dimension_numbers<[1], [0], [0], [1], [0, 0, 1, 1], [], []>} : vector<4x8xf32>, vector<8x2xf32>, vector<4x2xf32> -> vector<4x2xf32>
    %cst_10 = arith.constant 3.125000e-02 : f32
    %7 = vector.broadcast %cst_10 : f32 to vector<4x2xf32>
    %8 = arith.mulf %6, %7 : vector<4x2xf32>
    %cst_11 = arith.constant dense<0.000000e+00> : vector<4x32xf32>
    %9 = tpu.matmul %8, %2, %cst_11 {dimension_numbers = #tpu.dot_dimension_numbers<[1], [0], [0], [1], [0, 0, 1, 1], [], []>} : vector<4x2xf32>, vector<2x32xf32>, vector<4x32xf32> -> vector<4x32xf32>
    %cst_12 = arith.constant dense<0.000000e+00> : vector<8x32xf32>
    %10 = tpu.matmul %3, %9, %cst_12 {dimension_numbers = #tpu.dot_dimension_numbers<[1], [0], [0], [1], [0, 0, 1, 1], [], []>} : vector<8x4xf32>, vector<4x32xf32>, vector<8x32xf32> -> vector<8x32xf32>
    %11 = arith.subf %0, %10 : vector<8x32xf32>
    %12 = arith.mulf %11, %11 : vector<8x32xf32>
    %cst_13 = arith.constant dense<0.000000e+00> : vector<8x2xf32>
    %13 = tpu.matmul %12, %1, %cst_13 {dimension_numbers = #tpu.dot_dimension_numbers<[1], [0], [0], [1], [0, 0, 1, 1], [], []>} : vector<8x32xf32>, vector<32x2xf32>, vector<8x2xf32> -> vector<8x2xf32>
    %cst_14 = arith.constant dense<0.000000e+00> : vector<4x2xf32>
    %14 = tpu.matmul %4, %13, %cst_14 {dimension_numbers = #tpu.dot_dimension_numbers<[1], [0], [0], [1], [0, 0, 1, 1], [], []>} : vector<4x8xf32>, vector<8x2xf32>, vector<4x2xf32> -> vector<4x2xf32>
    %cst_15 = arith.constant 0.0322580636 : f32
    %15 = vector.broadcast %cst_15 : f32 to vector<4x2xf32>
    %16 = arith.mulf %14, %15 : vector<4x2xf32>
    %17 = math.sqrt %16 : vector<4x2xf32>
    %cst_16 = arith.constant 1.000000e-10 : f32
    %18 = vector.broadcast %cst_16 : f32 to vector<4x2xf32>
    %19 = arith.addf %17, %18 : vector<4x2xf32>
    %cst_17 = arith.constant 1.000000e+00 : f32
    %20 = vector.broadcast %cst_17 : f32 to vector<4x2xf32>
    %21 = arith.divf %20, %19 : vector<4x2xf32>
    %c0_18 = arith.constant 0 : index
    %c0_19 = arith.constant 0 : index
    %22 = vector.load %arg5[%c0_18, %c0_19] : memref<8x4xf32, #tpu.memory_space<vmem>>, vector<8x4xf32>
    %cst_20 = arith.constant dense<0.000000e+00> : vector<4x32xf32>
    %23 = tpu.matmul %21, %2, %cst_20 {dimension_numbers = #tpu.dot_dimension_numbers<[1], [0], [0], [1], [0, 0, 1, 1], [], []>} : vector<4x2xf32>, vector<2x32xf32>, vector<4x32xf32> -> vector<4x32xf32>
    %cst_21 = arith.constant dense<0.000000e+00> : vector<8x32xf32>
    %24 = tpu.matmul %22, %23, %cst_21 {dimension_numbers = #tpu.dot_dimension_numbers<[1], [0], [0], [1], [0, 0, 1, 1], [], []>} : vector<8x4xf32>, vector<4x32xf32>, vector<8x32xf32> -> vector<8x32xf32>
    %25 = arith.mulf %11, %24 : vector<8x32xf32>
    %c0_22 = arith.constant 0 : index
    %c0_23 = arith.constant 0 : index
    %26 = vector.load %arg2[%c0_22, %c0_23] : memref<8x1xf32, #tpu.memory_space<vmem>>, vector<8x1xf32>
    %27 = vector.broadcast %26 : vector<8x1xf32> to vector<8x32xf32>
    %28 = arith.addf %25, %27 : vector<8x32xf32>
    %c0_24 = arith.constant 0 : index
    %c0_25 = arith.constant 0 : index
    %29 = vector.load %arg3[%c0_24, %c0_25] : memref<8x1xf32, #tpu.memory_space<vmem>>, vector<8x1xf32>
    %30 = vector.broadcast %29 : vector<8x1xf32> to vector<8x32xf32>
    %31 = arith.mulf %28, %30 : vector<8x32xf32>
    %32 = arith.negf %31 : vector<8x32xf32>
    %33 = math.exp %32 : vector<8x32xf32>
    %cst_26 = arith.constant 1.000000e+00 : f32
    %34 = vector.broadcast %cst_26 : f32 to vector<8x32xf32>
    %35 = arith.addf %34, %33 : vector<8x32xf32>
    %36 = arith.divf %34, %35 : vector<8x32xf32>
    %cst_27 = arith.constant 5.000000e-01 : f32
    %37 = vector.broadcast %cst_27 : f32 to vector<8x32xf32>
    %38 = arith.cmpf oge, %36, %37 : vector<8x32xf32>
    %cst_28 = arith.constant 0.000000e+00 : f32
    %39 = vector.broadcast %cst_28 : f32 to vector<8x32xf32>
    %40 = arith.select %38, %28, %39 : vector<8x32xi1>, vector<8x32xf32>
    %41 = arith.subf %28, %40 : vector<8x32xf32>
    %c4_i32 = arith.constant 4 : i32
    %42 = tpu.dynamic_rotate %41 by %c4_i32 dim 0 : vector<8x32xf32>, i32 -> vector<8x32xf32>
    %43 = arith.addf %40, %42 : vector<8x32xf32>
    %c0_29 = arith.constant 0 : index
    %c0_30 = arith.constant 0 : index
    %44 = vector.load %arg7[%c0_29, %c0_30] : memref<4x8xbf16, #tpu.memory_space<vmem>>, vector<4x8xbf16>
    %45 = arith.truncf %43 : vector<8x32xf32> to vector<8x32xbf16>
    %cst_31 = arith.constant dense<0.000000e+00> : vector<4x32xf32>
    %46 = tpu.matmul %44, %45, %cst_31 {dimension_numbers = #tpu.dot_dimension_numbers<[1], [0], [0], [1], [0, 0, 1, 1], [], []>} : vector<4x8xbf16>, vector<8x32xbf16>, vector<4x32xf32> -> vector<4x32xf32>
    %47 = vector.extract_strided_slice %46 {offsets = [0, 0], sizes = [2, 32], strides = [1, 1]} : vector<4x32xf32> to vector<2x32xf32>
    %48 = vector.extract_strided_slice %46 {offsets = [2, 0], sizes = [2, 32], strides = [1, 1]} : vector<4x32xf32> to vector<2x32xf32>
    %c0_32 = arith.constant 0 : index
    %c0_33 = arith.constant 0 : index
    %49 = vector.load %arg15[%c0_32, %c0_33] : memref<2x32xf32, #tpu.memory_space<vmem>>, vector<2x32xf32>
    %50 = vector.extract_strided_slice %49 {offsets = [0, 0], sizes = [1, 32], strides = [1, 1]} : vector<2x32xf32> to vector<1x32xf32>
    %51 = vector.extract_strided_slice %49 {offsets = [1, 0], sizes = [1, 32], strides = [1, 1]} : vector<2x32xf32> to vector<1x32xf32>
    %52 = arith.truncf %47 : vector<2x32xf32> to vector<2x32xbf16>
    %c1_i32 = arith.constant 1 : i32
    %53 = tpu.dynamic_rotate %47 by %c1_i32 dim 1 : vector<2x32xf32>, i32 -> vector<2x32xf32>
    %54 = vector.broadcast %50 : vector<1x32xf32> to vector<2x32xf32>
    %55 = arith.mulf %53, %54 : vector<2x32xf32>
    %56 = arith.truncf %55 : vector<2x32xf32> to vector<2x32xbf16>
    %c31_i32 = arith.constant 31 : i32
    %57 = tpu.dynamic_rotate %47 by %c31_i32 dim 1 : vector<2x32xf32>, i32 -> vector<2x32xf32>
    %58 = vector.broadcast %51 : vector<1x32xf32> to vector<2x32xf32>
    %59 = arith.mulf %57, %58 : vector<2x32xf32>
    %60 = arith.truncf %59 : vector<2x32xf32> to vector<2x32xbf16>
    %c0_34 = arith.constant 0 : index
    %c0_35 = arith.constant 0 : index
    %61 = vector.load %arg9[%c0_34, %c0_35] : memref<8x2xbf16, #tpu.memory_space<vmem>>, vector<8x2xbf16>
    %cst_36 = arith.constant dense<0.000000e+00> : vector<8x32xf32>
    %62 = tpu.matmul %61, %52, %cst_36 {dimension_numbers = #tpu.dot_dimension_numbers<[1], [0], [0], [1], [0, 0, 1, 1], [], []>} : vector<8x2xbf16>, vector<2x32xbf16>, vector<8x32xf32> -> vector<8x32xf32>
    %c0_37 = arith.constant 0 : index
    %c0_38 = arith.constant 0 : index
    %63 = vector.load %arg8[%c0_37, %c0_38] : memref<8x2xbf16, #tpu.memory_space<vmem>>, vector<8x2xbf16>
    %cst_39 = arith.constant dense<0.000000e+00> : vector<8x32xf32>
    %64 = tpu.matmul %63, %56, %cst_39 {dimension_numbers = #tpu.dot_dimension_numbers<[1], [0], [0], [1], [0, 0, 1, 1], [], []>} : vector<8x2xbf16>, vector<2x32xbf16>, vector<8x32xf32> -> vector<8x32xf32>
    %65 = arith.addf %62, %64 : vector<8x32xf32>
    %c0_40 = arith.constant 0 : index
    %c0_41 = arith.constant 0 : index
    %66 = vector.load %arg10[%c0_40, %c0_41] : memref<8x2xbf16, #tpu.memory_space<vmem>>, vector<8x2xbf16>
    %cst_42 = arith.constant dense<0.000000e+00> : vector<8x32xf32>
    %67 = tpu.matmul %66, %60, %cst_42 {dimension_numbers = #tpu.dot_dimension_numbers<[1], [0], [0], [1], [0, 0, 1, 1], [], []>} : vector<8x2xbf16>, vector<2x32xbf16>, vector<8x32xf32> -> vector<8x32xf32>
    %68 = arith.addf %65, %67 : vector<8x32xf32>
    %c0_43 = arith.constant 0 : index
    %c0_44 = arith.constant 0 : index
    %69 = vector.load %arg11[%c0_43, %c0_44] : memref<8x1xf32, #tpu.memory_space<vmem>>, vector<8x1xf32>
    %70 = vector.broadcast %69 : vector<8x1xf32> to vector<8x32xf32>
    %71 = arith.addf %68, %70 : vector<8x32xf32>
    %c0_45 = arith.constant 0 : index
    %c0_46 = arith.constant 0 : index
    %72 = vector.load %arg12[%c0_45, %c0_46] : memref<6x2xbf16, #tpu.memory_space<vmem>>, vector<6x2xbf16>
    %73 = arith.truncf %48 : vector<2x32xf32> to vector<2x32xbf16>
    %cst_47 = arith.constant dense<0.000000e+00> : vector<6x32xf32>
    %74 = tpu.matmul %72, %73, %cst_47 {dimension_numbers = #tpu.dot_dimension_numbers<[1], [0], [0], [1], [0, 0, 1, 1], [], []>} : vector<6x2xbf16>, vector<2x32xbf16>, vector<6x32xf32> -> vector<6x32xf32>
    %cst_48 = arith.constant dense<0.000000e+00> : vector<8x2xf32>
    %75 = tpu.matmul %71, %1, %cst_48 {dimension_numbers = #tpu.dot_dimension_numbers<[1], [0], [0], [1], [0, 0, 1, 1], [], []>} : vector<8x32xf32>, vector<32x2xf32>, vector<8x2xf32> -> vector<8x2xf32>
    %cst_49 = arith.constant 6.250000e-02 : f32
    %76 = vector.broadcast %cst_49 : f32 to vector<8x2xf32>
    %77 = arith.mulf %75, %76 : vector<8x2xf32>
    %cst_50 = arith.constant dense<0.000000e+00> : vector<6x2xf32>
    %78 = tpu.matmul %74, %1, %cst_50 {dimension_numbers = #tpu.dot_dimension_numbers<[1], [0], [0], [1], [0, 0, 1, 1], [], []>} : vector<6x32xf32>, vector<32x2xf32>, vector<6x2xf32> -> vector<6x2xf32>
    %cst_51 = arith.constant 6.250000e-02 : f32
    %79 = vector.broadcast %cst_51 : f32 to vector<6x2xf32>
    %80 = arith.mulf %78, %79 : vector<6x2xf32>
    %cst_52 = arith.constant dense<0.000000e+00> : vector<2x2xf32>
    %81 = tpu.matmul %48, %1, %cst_52 {dimension_numbers = #tpu.dot_dimension_numbers<[1], [0], [0], [1], [0, 0, 1, 1], [], []>} : vector<2x32xf32>, vector<32x2xf32>, vector<2x2xf32> -> vector<2x2xf32>
    %cst_53 = arith.constant 6.250000e-02 : f32
    %82 = vector.broadcast %cst_53 : f32 to vector<2x2xf32>
    %83 = arith.mulf %81, %82 : vector<2x2xf32>
    %84 = tpu.concatenate %77, %80, %83 in 0 : vector<8x2xf32>, vector<6x2xf32>, vector<2x2xf32> -> vector<16x2xf32>
    %cst_54 = arith.constant dense<0xFF800000> : vector<2xf32>
    %85 = vector.multi_reduction <maximumf>, %84, %cst_54 [0] : vector<16x2xf32> to vector<2xf32>
    %86 = vector.shape_cast %85 : vector<2xf32> to vector<1x2xf32>
    %87 = vector.broadcast %86 : vector<1x2xf32> to vector<16x2xf32>
    %88 = arith.subf %84, %87 : vector<16x2xf32>
    %89 = math.exp %88 : vector<16x2xf32>
    %cst_55 = arith.constant dense<0.000000e+00> : vector<2xf32>
    %90 = vector.multi_reduction <add>, %89, %cst_55 [0] : vector<16x2xf32> to vector<2xf32>
    %91 = vector.shape_cast %90 : vector<2xf32> to vector<1x2xf32>
    %92 = vector.broadcast %91 : vector<1x2xf32> to vector<16x2xf32>
    %93 = arith.divf %89, %92 : vector<16x2xf32>
    %cst_56 = arith.constant dense<0.000000e+00> : vector<16x32xf32>
    %94 = tpu.matmul %93, %2, %cst_56 {dimension_numbers = #tpu.dot_dimension_numbers<[1], [0], [0], [1], [0, 0, 1, 1], [], []>} : vector<16x2xf32>, vector<2x32xf32>, vector<16x32xf32> -> vector<16x32xf32>
    %95 = vector.extract_strided_slice %94 {offsets = [0, 0], sizes = [8, 32], strides = [1, 1]} : vector<16x32xf32> to vector<8x32xf32>
    %96 = arith.mulf %95, %71 : vector<8x32xf32>
    %97 = vector.extract_strided_slice %96 {offsets = [0, 0], sizes = [6, 32], strides = [1, 1]} : vector<8x32xf32> to vector<6x32xf32>
    %98 = vector.extract_strided_slice %94 {offsets = [8, 0], sizes = [6, 32], strides = [1, 1]} : vector<16x32xf32> to vector<6x32xf32>
    %99 = arith.mulf %98, %74 : vector<6x32xf32>
    %100 = arith.addf %97, %99 : vector<6x32xf32>
    %c0_57 = arith.constant 0 : index
    %c0_58 = arith.constant 0 : index
    %101 = vector.load %arg16[%c0_57, %c0_58] : memref<8x32xf32, #tpu.memory_space<vmem>>, vector<6x32xf32>
    tpu.vector_store %arg16[%c0_57, %c0_58], %100 {strides = array<i32>} : memref<8x32xf32, #tpu.memory_space<vmem>>, vector<6x32xf32>,
    %102 = vector.extract_strided_slice %96 {offsets = [6, 0], sizes = [2, 32], strides = [1, 1]} : vector<8x32xf32> to vector<2x32xf32>
    %103 = vector.extract_strided_slice %94 {offsets = [14, 0], sizes = [2, 32], strides = [1, 1]} : vector<16x32xf32> to vector<2x32xf32>
    %104 = arith.mulf %103, %48 : vector<2x32xf32>
    %105 = arith.addf %102, %104 : vector<2x32xf32>
    %c6 = arith.constant 6 : index
    %c0_59 = arith.constant 0 : index
    %106 = vector.load %arg16[%c6, %c0_59] : memref<8x32xf32, #tpu.memory_space<vmem>>, vector<2x32xf32>
    tpu.vector_store %arg16[%c6, %c0_59], %105 {strides = array<i32>} : memref<8x32xf32, #tpu.memory_space<vmem>>, vector<2x32xf32>,
    return
  }
  func.func @transform_0(%arg0: i32) -> (i32, i32) {
    %c0_i32 = arith.constant 0 : i32
    %c0_i32_0 = arith.constant 0 : i32
    return %c0_i32, %arg0 : i32, i32
  }
  func.func @transform_1(%arg0: i32) -> (i32, i32) {
    %c0_i32 = arith.constant 0 : i32
    %c0_i32_0 = arith.constant 0 : i32
    %c0_i32_1 = arith.constant 0 : i32
    return %c0_i32, %c0_i32_0 : i32, i32
  }
  func.func @transform_2(%arg0: i32) -> (i32, i32) {
    %c0_i32 = arith.constant 0 : i32
    %c0_i32_0 = arith.constant 0 : i32
    %c0_i32_1 = arith.constant 0 : i32
    return %c0_i32, %c0_i32_0 : i32, i32
  }
  func.func @transform_3(%arg0: i32) -> (i32, i32) {
    %c0_i32 = arith.constant 0 : i32
    %c0_i32_0 = arith.constant 0 : i32
    %c0_i32_1 = arith.constant 0 : i32
    return %c0_i32, %c0_i32_0 : i32, i32
  }
  func.func @transform_4(%arg0: i32) -> (i32, i32) {
    %c0_i32 = arith.constant 0 : i32
    %c0_i32_0 = arith.constant 0 : i32
    %c0_i32_1 = arith.constant 0 : i32
    return %c0_i32, %c0_i32_0 : i32, i32
  }
  func.func @transform_5(%arg0: i32) -> (i32, i32) {
    %c0_i32 = arith.constant 0 : i32
    %c0_i32_0 = arith.constant 0 : i32
    %c0_i32_1 = arith.constant 0 : i32
    return %c0_i32, %c0_i32_0 : i32, i32
  }
  func.func @transform_6(%arg0: i32) -> (i32, i32) {
    %c0_i32 = arith.constant 0 : i32
    %c0_i32_0 = arith.constant 0 : i32
    %c0_i32_1 = arith.constant 0 : i32
    return %c0_i32, %c0_i32_0 : i32, i32
  }
  func.func @transform_7(%arg0: i32) -> (i32, i32) {
    %c0_i32 = arith.constant 0 : i32
    %c0_i32_0 = arith.constant 0 : i32
    %c0_i32_1 = arith.constant 0 : i32
    return %c0_i32, %c0_i32_0 : i32, i32
  }
  func.func @transform_8(%arg0: i32) -> (i32, i32) {
    %c0_i32 = arith.constant 0 : i32
    %c0_i32_0 = arith.constant 0 : i32
    %c0_i32_1 = arith.constant 0 : i32
    return %c0_i32, %c0_i32_0 : i32, i32
  }
  func.func @transform_9(%arg0: i32) -> (i32, i32) {
    %c0_i32 = arith.constant 0 : i32
    %c0_i32_0 = arith.constant 0 : i32
    %c0_i32_1 = arith.constant 0 : i32
    return %c0_i32, %c0_i32_0 : i32, i32
  }
  func.func @transform_10(%arg0: i32) -> (i32, i32) {
    %c0_i32 = arith.constant 0 : i32
    %c0_i32_0 = arith.constant 0 : i32
    %c0_i32_1 = arith.constant 0 : i32
    return %c0_i32, %c0_i32_0 : i32, i32
  }
  func.func @transform_11(%arg0: i32) -> (i32, i32) {
    %c0_i32 = arith.constant 0 : i32
    %c0_i32_0 = arith.constant 0 : i32
    %c0_i32_1 = arith.constant 0 : i32
    return %c0_i32, %c0_i32_0 : i32, i32
  }
  func.func @transform_12(%arg0: i32) -> (i32, i32) {
    %c0_i32 = arith.constant 0 : i32
    %c0_i32_0 = arith.constant 0 : i32
    %c0_i32_1 = arith.constant 0 : i32
    return %c0_i32, %c0_i32_0 : i32, i32
  }
  func.func @transform_13(%arg0: i32) -> (i32, i32) {
    %c0_i32 = arith.constant 0 : i32
    %c0_i32_0 = arith.constant 0 : i32
    %c0_i32_1 = arith.constant 0 : i32
    return %c0_i32, %c0_i32_0 : i32, i32
  }
  func.func @transform_14(%arg0: i32) -> (i32, i32) {
    %c0_i32 = arith.constant 0 : i32
    %c0_i32_0 = arith.constant 0 : i32
    %c0_i32_1 = arith.constant 0 : i32
    return %c0_i32, %c0_i32_0 : i32, i32
  }
  func.func @transform_15(%arg0: i32) -> (i32, i32) {
    %c0_i32 = arith.constant 0 : i32
    %c0_i32_0 = arith.constant 0 : i32
    return %c0_i32, %arg0 : i32, i32
  }
}

module attributes {stable_mosaic.version = 11 : i64} {
  func.func @scconv_kernel(%arg0: i32, %arg1: memref<8x32xf32, #tpu.memory_space<vmem>>, %arg2: memref<8x1xf32, #tpu.memory_space<vmem>>, %arg3: memref<8x1xf32, #tpu.memory_space<vmem>>, %arg4: memref<8x4xf32, #tpu.memory_space<vmem>>, %arg5: memref<8x4xf32, #tpu.memory_space<vmem>>, %arg6: memref<4x8xf32, #tpu.memory_space<vmem>>, %arg7: memref<4x8xbf16, #tpu.memory_space<vmem>>, %arg8: memref<8x2xbf16, #tpu.memory_space<vmem>>, %arg9: memref<8x2xbf16, #tpu.memory_space<vmem>>, %arg10: memref<8x2xbf16, #tpu.memory_space<vmem>>, %arg11: memref<8x1xf32, #tpu.memory_space<vmem>>, %arg12: memref<6x2xbf16, #tpu.memory_space<vmem>>, %arg13: memref<32x2xf32, #tpu.memory_space<vmem>>, %arg14: memref<2x32xf32, #tpu.memory_space<vmem>>, %arg15: memref<2x32xf32, #tpu.memory_space<vmem>>, %arg16: memref<8x32xf32, #tpu.memory_space<vmem>>) attributes {dimension_semantics = [#tpu.dimension_semantics<parallel>], iteration_bounds = array<i64: 1>, scalar_prefetch = 0 : i64, scratch_operands = 0 : i64, tpu.core_type = #tpu.core_type<tc>, window_params = [{transform_indices = @transform_0, window_bounds = array<i64: 8, 32>}, {pipeline_mode = #tpu.pipeline_mode<synchronous>, transform_indices = @transform_1, window_bounds = array<i64: 8, 1>}, {pipeline_mode = #tpu.pipeline_mode<synchronous>, transform_indices = @transform_2, window_bounds = array<i64: 8, 1>}, {pipeline_mode = #tpu.pipeline_mode<synchronous>, transform_indices = @transform_3, window_bounds = array<i64: 8, 4>}, {pipeline_mode = #tpu.pipeline_mode<synchronous>, transform_indices = @transform_4, window_bounds = array<i64: 8, 4>}, {pipeline_mode = #tpu.pipeline_mode<synchronous>, transform_indices = @transform_5, window_bounds = array<i64: 4, 8>}, {pipeline_mode = #tpu.pipeline_mode<synchronous>, transform_indices = @transform_6, window_bounds = array<i64: 4, 8>}, {pipeline_mode = #tpu.pipeline_mode<synchronous>, transform_indices = @transform_7, window_bounds = array<i64: 8, 2>}, {pipeline_mode = #tpu.pipeline_mode<synchronous>, transform_indices = @transform_8, window_bounds = array<i64: 8, 2>}, {pipeline_mode = #tpu.pipeline_mode<synchronous>, transform_indices = @transform_9, window_bounds = array<i64: 8, 2>}, {pipeline_mode = #tpu.pipeline_mode<synchronous>, transform_indices = @transform_10, window_bounds = array<i64: 8, 1>}, {pipeline_mode = #tpu.pipeline_mode<synchronous>, transform_indices = @transform_11, window_bounds = array<i64: 6, 2>}, {pipeline_mode = #tpu.pipeline_mode<synchronous>, transform_indices = @transform_12, window_bounds = array<i64: 32, 2>}, {pipeline_mode = #tpu.pipeline_mode<synchronous>, transform_indices = @transform_13, window_bounds = array<i64: 2, 32>}, {pipeline_mode = #tpu.pipeline_mode<synchronous>, transform_indices = @transform_14, window_bounds = array<i64: 2, 32>}, {transform_indices = @transform_15, window_bounds = array<i64: 8, 32>}]} {
    %c0 = arith.constant 0 : index
    %c0_0 = arith.constant 0 : index
    %0 = vector.load %arg1[%c0, %c0_0] : memref<8x32xf32, #tpu.memory_space<vmem>>, vector<8x32xf32>
    %c0_1 = arith.constant 0 : index
    %c0_2 = arith.constant 0 : index
    %1 = vector.load %arg13[%c0_1, %c0_2] : memref<32x2xf32, #tpu.memory_space<vmem>>, vector<32x2xf32>
    %c0_3 = arith.constant 0 : index
    %c0_4 = arith.constant 0 : index
    %2 = vector.load %arg14[%c0_3, %c0_4] : memref<2x32xf32, #tpu.memory_space<vmem>>, vector<2x32xf32>
    %c0_5 = arith.constant 0 : index
    %c0_6 = arith.constant 0 : index
    %3 = vector.load %arg4[%c0_5, %c0_6] : memref<8x4xf32, #tpu.memory_space<vmem>>, vector<8x4xf32>
    %c0_7 = arith.constant 0 : index
    %c0_8 = arith.constant 0 : index
    %4 = vector.load %arg6[%c0_7, %c0_8] : memref<4x8xf32, #tpu.memory_space<vmem>>, vector<4x8xf32>
    %cst = arith.constant dense<0.000000e+00> : vector<8x2xf32>
    %5 = tpu.matmul %0, %1, %cst {dimension_numbers = #tpu.dot_dimension_numbers<[1], [0], [0], [1], [0, 0, 1, 1], [], []>} : vector<8x32xf32>, vector<32x2xf32>, vector<8x2xf32> -> vector<8x2xf32>
    %cst_9 = arith.constant dense<0.000000e+00> : vector<4x2xf32>
    %6 = tpu.matmul %4, %5, %cst_9 {dimension_numbers = #tpu.dot_dimension_numbers<[1], [0], [0], [1], [0, 0, 1, 1], [], []>} : vector<4x8xf32>, vector<8x2xf32>, vector<4x2xf32> -> vector<4x2xf32>
    %cst_10 = arith.constant 3.125000e-02 : f32
    %7 = vector.broadcast %cst_10 : f32 to vector<4x2xf32>
    %8 = arith.mulf %6, %7 : vector<4x2xf32>
    %cst_11 = arith.constant dense<0.000000e+00> : vector<4x32xf32>
    %9 = tpu.matmul %8, %2, %cst_11 {dimension_numbers = #tpu.dot_dimension_numbers<[1], [0], [0], [1], [0, 0, 1, 1], [], []>} : vector<4x2xf32>, vector<2x32xf32>, vector<4x32xf32> -> vector<4x32xf32>
    %cst_12 = arith.constant dense<0.000000e+00> : vector<8x32xf32>
    %10 = tpu.matmul %3, %9, %cst_12 {dimension_numbers = #tpu.dot_dimension_numbers<[1], [0], [0], [1], [0, 0, 1, 1], [], []>} : vector<8x4xf32>, vector<4x32xf32>, vector<8x32xf32> -> vector<8x32xf32>
    %11 = arith.subf %0, %10 : vector<8x32xf32>
    %12 = arith.mulf %11, %11 : vector<8x32xf32>
    %cst_13 = arith.constant dense<0.000000e+00> : vector<8x2xf32>
    %13 = tpu.matmul %12, %1, %cst_13 {dimension_numbers = #tpu.dot_dimension_numbers<[1], [0], [0], [1], [0, 0, 1, 1], [], []>} : vector<8x32xf32>, vector<32x2xf32>, vector<8x2xf32> -> vector<8x2xf32>
    %cst_14 = arith.constant dense<0.000000e+00> : vector<4x2xf32>
    %14 = tpu.matmul %4, %13, %cst_14 {dimension_numbers = #tpu.dot_dimension_numbers<[1], [0], [0], [1], [0, 0, 1, 1], [], []>} : vector<4x8xf32>, vector<8x2xf32>, vector<4x2xf32> -> vector<4x2xf32>
    %cst_15 = arith.constant 0.0322580636 : f32
    %15 = vector.broadcast %cst_15 : f32 to vector<4x2xf32>
    %16 = arith.mulf %14, %15 : vector<4x2xf32>
    %17 = math.sqrt %16 : vector<4x2xf32>
    %cst_16 = arith.constant 1.000000e-10 : f32
    %18 = vector.broadcast %cst_16 : f32 to vector<4x2xf32>
    %19 = arith.addf %17, %18 : vector<4x2xf32>
    %cst_17 = arith.constant 1.000000e+00 : f32
    %20 = vector.broadcast %cst_17 : f32 to vector<4x2xf32>
    %21 = arith.divf %20, %19 : vector<4x2xf32>
    %c0_18 = arith.constant 0 : index
    %c0_19 = arith.constant 0 : index
    %22 = vector.load %arg5[%c0_18, %c0_19] : memref<8x4xf32, #tpu.memory_space<vmem>>, vector<8x4xf32>
    %cst_20 = arith.constant dense<0.000000e+00> : vector<4x32xf32>
    %23 = tpu.matmul %21, %2, %cst_20 {dimension_numbers = #tpu.dot_dimension_numbers<[1], [0], [0], [1], [0, 0, 1, 1], [], []>} : vector<4x2xf32>, vector<2x32xf32>, vector<4x32xf32> -> vector<4x32xf32>
    %cst_21 = arith.constant dense<0.000000e+00> : vector<8x32xf32>
    %24 = tpu.matmul %22, %23, %cst_21 {dimension_numbers = #tpu.dot_dimension_numbers<[1], [0], [0], [1], [0, 0, 1, 1], [], []>} : vector<8x4xf32>, vector<4x32xf32>, vector<8x32xf32> -> vector<8x32xf32>
    %25 = arith.mulf %11, %24 : vector<8x32xf32>
    %c0_22 = arith.constant 0 : index
    %c0_23 = arith.constant 0 : index
    %26 = vector.load %arg2[%c0_22, %c0_23] : memref<8x1xf32, #tpu.memory_space<vmem>>, vector<8x1xf32>
    %27 = vector.broadcast %26 : vector<8x1xf32> to vector<8x32xf32>
    %28 = arith.addf %25, %27 : vector<8x32xf32>
    %c0_24 = arith.constant 0 : index
    %c0_25 = arith.constant 0 : index
    %29 = vector.load %arg3[%c0_24, %c0_25] : memref<8x1xf32, #tpu.memory_space<vmem>>, vector<8x1xf32>
    %30 = vector.broadcast %29 : vector<8x1xf32> to vector<8x32xf32>
    %31 = arith.mulf %28, %30 : vector<8x32xf32>
    %32 = arith.negf %31 : vector<8x32xf32>
    %33 = math.exp %32 : vector<8x32xf32>
    %cst_26 = arith.constant 1.000000e+00 : f32
    %34 = vector.broadcast %cst_26 : f32 to vector<8x32xf32>
    %35 = arith.addf %34, %33 : vector<8x32xf32>
    %36 = arith.divf %34, %35 : vector<8x32xf32>
    %cst_27 = arith.constant 5.000000e-01 : f32
    %37 = vector.broadcast %cst_27 : f32 to vector<8x32xf32>
    %38 = arith.cmpf oge, %36, %37 : vector<8x32xf32>
    %cst_28 = arith.constant 0.000000e+00 : f32
    %39 = vector.broadcast %cst_28 : f32 to vector<8x32xf32>
    %40 = arith.select %38, %28, %39 : vector<8x32xi1>, vector<8x32xf32>
    %41 = arith.subf %28, %40 : vector<8x32xf32>
    %c4_i32 = arith.constant 4 : i32
    %42 = tpu.dynamic_rotate %41 by %c4_i32 dim 0 : vector<8x32xf32>, i32 -> vector<8x32xf32>
    %43 = arith.addf %40, %42 : vector<8x32xf32>
    %c0_29 = arith.constant 0 : index
    %c0_30 = arith.constant 0 : index
    %44 = vector.load %arg7[%c0_29, %c0_30] : memref<4x8xbf16, #tpu.memory_space<vmem>>, vector<4x8xbf16>
    %45 = arith.truncf %43 : vector<8x32xf32> to vector<8x32xbf16>
    %cst_31 = arith.constant dense<0.000000e+00> : vector<4x32xf32>
    %46 = tpu.matmul %44, %45, %cst_31 {dimension_numbers = #tpu.dot_dimension_numbers<[1], [0], [0], [1], [0, 0, 1, 1], [], []>} : vector<4x8xbf16>, vector<8x32xbf16>, vector<4x32xf32> -> vector<4x32xf32>
    %47 = vector.extract_strided_slice %46 {offsets = [0, 0], sizes = [2, 32], strides = [1, 1]} : vector<4x32xf32> to vector<2x32xf32>
    %48 = vector.extract_strided_slice %46 {offsets = [2, 0], sizes = [2, 32], strides = [1, 1]} : vector<4x32xf32> to vector<2x32xf32>
    %c0_32 = arith.constant 0 : index
    %c0_33 = arith.constant 0 : index
    %49 = vector.load %arg15[%c0_32, %c0_33] : memref<2x32xf32, #tpu.memory_space<vmem>>, vector<2x32xf32>
    %50 = vector.extract_strided_slice %49 {offsets = [0, 0], sizes = [1, 32], strides = [1, 1]} : vector<2x32xf32> to vector<1x32xf32>
    %51 = vector.extract_strided_slice %49 {offsets = [1, 0], sizes = [1, 32], strides = [1, 1]} : vector<2x32xf32> to vector<1x32xf32>
    %52 = arith.truncf %47 : vector<2x32xf32> to vector<2x32xbf16>
    %c1_i32 = arith.constant 1 : i32
    %53 = tpu.dynamic_rotate %47 by %c1_i32 dim 1 : vector<2x32xf32>, i32 -> vector<2x32xf32>
    %54 = vector.broadcast %50 : vector<1x32xf32> to vector<2x32xf32>
    %55 = arith.mulf %53, %54 : vector<2x32xf32>
    %56 = arith.truncf %55 : vector<2x32xf32> to vector<2x32xbf16>
    %c31_i32 = arith.constant 31 : i32
    %57 = tpu.dynamic_rotate %47 by %c31_i32 dim 1 : vector<2x32xf32>, i32 -> vector<2x32xf32>
    %58 = vector.broadcast %51 : vector<1x32xf32> to vector<2x32xf32>
    %59 = arith.mulf %57, %58 : vector<2x32xf32>
    %60 = arith.truncf %59 : vector<2x32xf32> to vector<2x32xbf16>
    %c0_34 = arith.constant 0 : index
    %c0_35 = arith.constant 0 : index
    %61 = vector.load %arg9[%c0_34, %c0_35] : memref<8x2xbf16, #tpu.memory_space<vmem>>, vector<8x2xbf16>
    %cst_36 = arith.constant dense<0.000000e+00> : vector<8x32xf32>
    %62 = tpu.matmul %61, %52, %cst_36 {dimension_numbers = #tpu.dot_dimension_numbers<[1], [0], [0], [1], [0, 0, 1, 1], [], []>} : vector<8x2xbf16>, vector<2x32xbf16>, vector<8x32xf32> -> vector<8x32xf32>
    %c0_37 = arith.constant 0 : index
    %c0_38 = arith.constant 0 : index
    %63 = vector.load %arg8[%c0_37, %c0_38] : memref<8x2xbf16, #tpu.memory_space<vmem>>, vector<8x2xbf16>
    %cst_39 = arith.constant dense<0.000000e+00> : vector<8x32xf32>
    %64 = tpu.matmul %63, %56, %cst_39 {dimension_numbers = #tpu.dot_dimension_numbers<[1], [0], [0], [1], [0, 0, 1, 1], [], []>} : vector<8x2xbf16>, vector<2x32xbf16>, vector<8x32xf32> -> vector<8x32xf32>
    %65 = arith.addf %62, %64 : vector<8x32xf32>
    %c0_40 = arith.constant 0 : index
    %c0_41 = arith.constant 0 : index
    %66 = vector.load %arg10[%c0_40, %c0_41] : memref<8x2xbf16, #tpu.memory_space<vmem>>, vector<8x2xbf16>
    %cst_42 = arith.constant dense<0.000000e+00> : vector<8x32xf32>
    %67 = tpu.matmul %66, %60, %cst_42 {dimension_numbers = #tpu.dot_dimension_numbers<[1], [0], [0], [1], [0, 0, 1, 1], [], []>} : vector<8x2xbf16>, vector<2x32xbf16>, vector<8x32xf32> -> vector<8x32xf32>
    %68 = arith.addf %65, %67 : vector<8x32xf32>
    %c0_43 = arith.constant 0 : index
    %c0_44 = arith.constant 0 : index
    %69 = vector.load %arg11[%c0_43, %c0_44] : memref<8x1xf32, #tpu.memory_space<vmem>>, vector<8x1xf32>
    %70 = vector.broadcast %69 : vector<8x1xf32> to vector<8x32xf32>
    %71 = arith.addf %68, %70 : vector<8x32xf32>
    %c0_45 = arith.constant 0 : index
    %c0_46 = arith.constant 0 : index
    %72 = vector.load %arg12[%c0_45, %c0_46] : memref<6x2xbf16, #tpu.memory_space<vmem>>, vector<6x2xbf16>
    %73 = arith.truncf %48 : vector<2x32xf32> to vector<2x32xbf16>
    %cst_47 = arith.constant dense<0.000000e+00> : vector<6x32xf32>
    %74 = tpu.matmul %72, %73, %cst_47 {dimension_numbers = #tpu.dot_dimension_numbers<[1], [0], [0], [1], [0, 0, 1, 1], [], []>} : vector<6x2xbf16>, vector<2x32xbf16>, vector<6x32xf32> -> vector<6x32xf32>
    %cst_48 = arith.constant dense<0.000000e+00> : vector<8x2xf32>
    %75 = tpu.matmul %71, %1, %cst_48 {dimension_numbers = #tpu.dot_dimension_numbers<[1], [0], [0], [1], [0, 0, 1, 1], [], []>} : vector<8x32xf32>, vector<32x2xf32>, vector<8x2xf32> -> vector<8x2xf32>
    %cst_49 = arith.constant 6.250000e-02 : f32
    %76 = vector.broadcast %cst_49 : f32 to vector<8x2xf32>
    %77 = arith.mulf %75, %76 : vector<8x2xf32>
    %cst_50 = arith.constant dense<0.000000e+00> : vector<6x2xf32>
    %78 = tpu.matmul %74, %1, %cst_50 {dimension_numbers = #tpu.dot_dimension_numbers<[1], [0], [0], [1], [0, 0, 1, 1], [], []>} : vector<6x32xf32>, vector<32x2xf32>, vector<6x2xf32> -> vector<6x2xf32>
    %cst_51 = arith.constant 6.250000e-02 : f32
    %79 = vector.broadcast %cst_51 : f32 to vector<6x2xf32>
    %80 = arith.mulf %78, %79 : vector<6x2xf32>
    %cst_52 = arith.constant dense<0.000000e+00> : vector<2x2xf32>
    %81 = tpu.matmul %48, %1, %cst_52 {dimension_numbers = #tpu.dot_dimension_numbers<[1], [0], [0], [1], [0, 0, 1, 1], [], []>} : vector<2x32xf32>, vector<32x2xf32>, vector<2x2xf32> -> vector<2x2xf32>
    %cst_53 = arith.constant 6.250000e-02 : f32
    %82 = vector.broadcast %cst_53 : f32 to vector<2x2xf32>
    %83 = arith.mulf %81, %82 : vector<2x2xf32>
    %84 = tpu.concatenate %77, %80, %83 in 0 : vector<8x2xf32>, vector<6x2xf32>, vector<2x2xf32> -> vector<16x2xf32>
    %cst_54 = arith.constant dense<0xFF800000> : vector<2xf32>
    %85 = vector.multi_reduction <maximumf>, %84, %cst_54 [0] : vector<16x2xf32> to vector<2xf32>
    %86 = vector.shape_cast %85 : vector<2xf32> to vector<1x2xf32>
    %87 = vector.broadcast %86 : vector<1x2xf32> to vector<16x2xf32>
    %88 = arith.subf %84, %87 : vector<16x2xf32>
    %89 = math.exp %88 : vector<16x2xf32>
    %cst_55 = arith.constant dense<0.000000e+00> : vector<2xf32>
    %90 = vector.multi_reduction <add>, %89, %cst_55 [0] : vector<16x2xf32> to vector<2xf32>
    %91 = vector.shape_cast %90 : vector<2xf32> to vector<1x2xf32>
    %92 = vector.broadcast %91 : vector<1x2xf32> to vector<16x2xf32>
    %93 = arith.divf %89, %92 : vector<16x2xf32>
    %cst_56 = arith.constant dense<0.000000e+00> : vector<16x32xf32>
    %94 = tpu.matmul %93, %2, %cst_56 {dimension_numbers = #tpu.dot_dimension_numbers<[1], [0], [0], [1], [0, 0, 1, 1], [], []>} : vector<16x2xf32>, vector<2x32xf32>, vector<16x32xf32> -> vector<16x32xf32>
    %95 = vector.extract_strided_slice %94 {offsets = [0, 0], sizes = [8, 32], strides = [1, 1]} : vector<16x32xf32> to vector<8x32xf32>
    %96 = arith.mulf %95, %71 : vector<8x32xf32>
    %97 = vector.extract_strided_slice %96 {offsets = [0, 0], sizes = [6, 32], strides = [1, 1]} : vector<8x32xf32> to vector<6x32xf32>
    %98 = vector.extract_strided_slice %94 {offsets = [8, 0], sizes = [6, 32], strides = [1, 1]} : vector<16x32xf32> to vector<6x32xf32>
    %99 = arith.mulf %98, %74 : vector<6x32xf32>
    %100 = arith.addf %97, %99 : vector<6x32xf32>
    %c0_57 = arith.constant 0 : index
    %c0_58 = arith.constant 0 : index
    %101 = vector.load %arg16[%c0_57, %c0_58] : memref<8x32xf32, #tpu.memory_space<vmem>>, vector<6x32xf32>
    tpu.vector_store %arg16[%c0_57, %c0_58], %100 {strides = array<i32>} : memref<8x32xf32, #tpu.memory_space<vmem>>, vector<6x32xf32>,
    %102 = vector.extract_strided_slice %96 {offsets = [6, 0], sizes = [2, 32], strides = [1, 1]} : vector<8x32xf32> to vector<2x32xf32>
    %103 = vector.extract_strided_slice %94 {offsets = [14, 0], sizes = [2, 32], strides = [1, 1]} : vector<16x32xf32> to vector<2x32xf32>
    %104 = arith.mulf %103, %48 : vector<2x32xf32>
    %105 = arith.addf %102, %104 : vector<2x32xf32>
    %c6 = arith.constant 6 : index
    %c0_59 = arith.constant 0 : index
    %106 = vector.load %arg16[%c6, %c0_59] : memref<8x32xf32, #tpu.memory_space<vmem>>, vector<2x32xf32>
    tpu.vector_store %arg16[%c6, %c0_59], %105 {strides = array<i32>} : memref<8x32xf32, #tpu.memory_space<vmem>>, vector<2x32xf32>,
    return
  }
  func.func @transform_0(%arg0: i32) -> (i32, i32) {
    %c0_i32 = arith.constant 0 : i32
    %c0_i32_0 = arith.constant 0 : i32
    return %c0_i32, %arg0 : i32, i32
  }
  func.func @transform_1(%arg0: i32) -> (i32, i32) {
    %c0_i32 = arith.constant 0 : i32
    %c0_i32_0 = arith.constant 0 : i32
    %c0_i32_1 = arith.constant 0 : i32
    return %c0_i32, %c0_i32_0 : i32, i32
  }
  func.func @transform_2(%arg0: i32) -> (i32, i32) {
    %c0_i32 = arith.constant 0 : i32
    %c0_i32_0 = arith.constant 0 : i32
    %c0_i32_1 = arith.constant 0 : i32
    return %c0_i32, %c0_i32_0 : i32, i32
  }
  func.func @transform_3(%arg0: i32) -> (i32, i32) {
    %c0_i32 = arith.constant 0 : i32
    %c0_i32_0 = arith.constant 0 : i32
    %c0_i32_1 = arith.constant 0 : i32
    return %c0_i32, %c0_i32_0 : i32, i32
  }
  func.func @transform_4(%arg0: i32) -> (i32, i32) {
    %c0_i32 = arith.constant 0 : i32
    %c0_i32_0 = arith.constant 0 : i32
    %c0_i32_1 = arith.constant 0 : i32
    return %c0_i32, %c0_i32_0 : i32, i32
  }
  func.func @transform_5(%arg0: i32) -> (i32, i32) {
    %c0_i32 = arith.constant 0 : i32
    %c0_i32_0 = arith.constant 0 : i32
    %c0_i32_1 = arith.constant 0 : i32
    return %c0_i32, %c0_i32_0 : i32, i32
  }
  func.func @transform_6(%arg0: i32) -> (i32, i32) {
    %c0_i32 = arith.constant 0 : i32
    %c0_i32_0 = arith.constant 0 : i32
    %c0_i32_1 = arith.constant 0 : i32
    return %c0_i32, %c0_i32_0 : i32, i32
  }
  func.func @transform_7(%arg0: i32) -> (i32, i32) {
    %c0_i32 = arith.constant 0 : i32
    %c0_i32_0 = arith.constant 0 : i32
    %c0_i32_1 = arith.constant 0 : i32
    return %c0_i32, %c0_i32_0 : i32, i32
  }
  func.func @transform_8(%arg0: i32) -> (i32, i32) {
    %c0_i32 = arith.constant 0 : i32
    %c0_i32_0 = arith.constant 0 : i32
    %c0_i32_1 = arith.constant 0 : i32
    return %c0_i32, %c0_i32_0 : i32, i32
  }
  func.func @transform_9(%arg0: i32) -> (i32, i32) {
    %c0_i32 = arith.constant 0 : i32
    %c0_i32_0 = arith.constant 0 : i32
    %c0_i32_1 = arith.constant 0 : i32
    return %c0_i32, %c0_i32_0 : i32, i32
  }
  func.func @transform_10(%arg0: i32) -> (i32, i32) {
    %c0_i32 = arith.constant 0 : i32
    %c0_i32_0 = arith.constant 0 : i32
    %c0_i32_1 = arith.constant 0 : i32
    return %c0_i32, %c0_i32_0 : i32, i32
  }
  func.func @transform_11(%arg0: i32) -> (i32, i32) {
    %c0_i32 = arith.constant 0 : i32
    %c0_i32_0 = arith.constant 0 : i32
    %c0_i32_1 = arith.constant 0 : i32
    return %c0_i32, %c0_i32_0 : i32, i32
  }
  func.func @transform_12(%arg0: i32) -> (i32, i32) {
    %c0_i32 = arith.constant 0 : i32
    %c0_i32_0 = arith.constant 0 : i32
    %c0_i32_1 = arith.constant 0 : i32
    return %c0_i32, %c0_i32_0 : i32, i32
  }
  func.func @transform_13(%arg0: i32) -> (i32, i32) {
    %c0_i32 = arith.constant 0 : i32
    %c0_i32_0 = arith.constant 0 : i32
    %c0_i32_1 = arith.constant 0 : i32
    return %c0_i32, %c0_i32_0 : i32, i32
  }
  func.func @transform_14(%arg0: i32) -> (i32, i32) {
    %c0_i32 = arith.constant 0 : i32
    %c0_i32_0 = arith.constant 0 : i32
    %c0_i32_1 = arith.constant 0 : i32
    return %c0_i32, %c0_i32_0 : i32, i32
  }
  func.func @transform_15(%arg0: i32) -> (i32, i32) {
    %c0_i32 = arith.constant 0 : i32
    %c0_i32_0 = arith.constant 0 : i32
    return %c0_i32, %arg0 : i32, i32
  }
}

</mosaic_0001>

<bundles_post_ra>
// kernel: tpu_custom_call.1
= control target key start
LH: loop header
LB: loop body
LE: loop exit
PB: predicated region body
PF: predicated region fallthrough
CT: control target
= control target key end

     0   :  { %s938_s0 = inlined_call_operand.vmem [shape: f32[8,32], index: 0, kind: input, shape index: {}]   ;;  %s939_s1 = inlined_call_operand.vmem [shape: f32[8,1], index: 1, kind: input, shape index: {}]   ;;  %s940_s2 = inlined_call_operand.vmem [shape: f32[8,1], index: 2, kind: input, shape index: {}]   ;;  %s941_s3 = inlined_call_operand.vmem [shape: f32[8,4], index: 3, kind: input, shape index: {}]   ;;  %s942_s4 = inlined_call_operand.vmem [shape: f32[8,4], index: 4, kind: input, shape index: {}]   ;;  %s943_s5 = inlined_call_operand.vmem [shape: f32[4,8], index: 5, kind: input, shape index: {}]   ;;  %s944_s6 = inlined_call_operand.vmem [shape: bf16[4,8], index: 6, kind: input, shape index: {}]   ;;  %s945_s7 = inlined_call_operand.vmem [shape: bf16[8,2], index: 7, kind: input, shape index: {}]   ;;  %s946_s8 = inlined_call_operand.vmem [shape: bf16[8,2], index: 8, kind: input, shape index: {}]   ;;  %s947_s9 = inlined_call_operand.vmem [shape: bf16[8,2], index: 9, kind: input, shape index: {}]   ;;  %s948_s10 = inlined_call_operand.vmem [shape: f32[8,1], index: 10, kind: input, shape index: {}]   ;;  %s949_s11 = inlined_call_operand.vmem [shape: bf16[6,2], index: 11, kind: input, shape index: {}]   ;;  %s950_s12 = inlined_call_operand.vmem [shape: f32[32,2], index: 12, kind: input, shape index: {}]   ;;  %s951_s13 = inlined_call_operand.vmem [shape: f32[2,32], index: 13, kind: input, shape index: {}]   ;;  %s952_s14 = inlined_call_operand.vmem [shape: f32[2,32], index: 14, kind: input, shape index: {}]   ;;  %s953_s15 = inlined_call_operand.hbm [shape: f32[8,32], index: 15, kind: output, shape index: {}]  }
   0x1   :  { %v806_v0 = vld [vmem:[%s950_s12 + $0x18] sm:$0xff]  ;;  %v811_v1 = vld [vmem:[%s950_s12 + $0x10] sm:$0xff] }
   0x2   :  { %76 = vmatpush.msra.mxu0 %v806_v0 }
   0x3   :  { %20 = vsyncpa [#allocation3], 0  ;;  %v817_v2 = vld [vmem:[%s950_s12 + $0x8] sm:$0xff]  ;;  %v823_v3 = vld [vmem:[%s950_s12] sm:$0xff]  ;;  %vm60_vm0 = vcmask 261120   ;;  %vm84_vm1 = vcmask 64512  }
   0x4   :  { %77 = vmatpush.msra.mxu0 %v811_v1  ;;  %v52_v4 = vld [vmem:[%s938_s0] sm:$0xff]  ;;  %vm113_vm2 = vcmask 1041408   ;;  %vm109_vm3 = vcmask 15360   ;;  %vm141_vm4 = vcmask 1043456   ;;  %vm137_vm5 = vcmask 31744   ;;  %s718_s21 = smov 31  }
   0x5   :  { %v59_v5 = vld [vmem:[%s943_s5] sm:$0xf]  ;;  %v716_v39 = vmov 0   ;;  %s719_s22 = smov 1   ;;  %s721_s25 = smov 97  }
   0x6   :  { %78 = vmatpush.msra.mxu0 %v817_v2  ;;  %v842_v7 = vld [vmem:[%s951_s13] sm:$0x3]  ;;  %674 = vset.pattern.permute.xlu0 %v716_v39  ;;  %s634_s30 = sshll.u32 %s953_s15, 4  ;;  %s635_s30 = int_to_ptr.hbm [resolvable:$true] %s634_s30 }
   0x7   :  { %645 = vmatpush.msk.msra.mxu3 %vm113_vm2, %v842_v7  ;;  %v58_v10 = vld [vmem:[%s941_s3] sm:$0xff]  ;;  %675 = vset.pattern.permute.xlu2 %v716_v39 }
   0x8   :  { %79 = vmatpush.msra.mxu0 %v823_v3  ;;  %v290_v40 = vld [vmem:[%s939_s1] sm:$0xff] }
   0x9   :  { %643 = vmatmul.msk.f32.vlgmr.msra.gmra.mxu0 %vm60_vm0, %v52_v4  ;;  %293 = vperm.xlu0 %674, %v290_v40   ;;  %v297_v41 = vld [vmem:[%s940_s2] sm:$0xff] }
   0xa   :  { %v239_v42 = vld [vmem:[%s942_s4] sm:$0xff]  ;;  %s717_s4 = smov 32  }
   0xb   :  { %v373_v39 = vld [vmem:[%s945_s7] sm:$0xf]  ;;  %s722_s7 = smov [#allocation2]  }
   0xc   :  { %v416_v40 = vld [vmem:[%s947_s9] sm:$0xf]  ;;  %s632_s9 = sshll.u32 %s722_s7, 4  ;;  %s633_s9 = int_to_ptr.vmem [resolvable:$true] %s632_s9 }
  0x11   :  { %300 = vperm.xlu0 %674, %v297_v41  }
  0x7b   :  { %v294_v44 = vpop.permute.xlu0 %293 }
  0x83   :  { %v301_v48 = vpop.permute.xlu0 %300 }
  0x86   :  { %v81_v6 = vpop.f32.mrf.mxu0 }
  0x87   :  { %103 = vmatpush.msra.mxu1 %v81_v6 }
  0x88   :  { %644 = vmatmul.msk.f32.vlgmr.msra.gmra.mxu1 %vm84_vm1, %v59_v5 }
  0x89   :  { %182 = vmatpush.msrb.mxu1 %v806_v0 }
  0x8b   :  { %183 = vmatpush.msrb.mxu1 %v811_v1 }
  0x8d   :  { %184 = vmatpush.msrb.mxu1 %v817_v2 }
  0x8f   :  { %185 = vmatpush.msrb.mxu1 %v823_v3 }
 0x105   :  { %v105_v8 = vpop.f32.mrf.mxu1 }
 0x106   :  { %v108_v9 = vmul.f32 0.03125, %v105_v8 }
 0x108   :  { %646 = vmatmul.msk.f32.vlgmr.msra.gmra.mxu3 %vm109_vm3, %v108_v9 }
 0x18b   :  { %v134_v11 = vpop.f32.mrf.mxu3 }
 0x18c   :  { %647 = vmatpush.msk.msrb.mxu3 %vm141_vm4, %v134_v11 }
 0x18d   :  { %648 = vmatmul.msk.f32.vlgmr.msrb.gmra.mxu3 %vm137_vm5, %v58_v10  ;;  %v328_v10 = vld [vmem:[%s944_s6] sm:$0x3] }
 0x18e   :  { %651 = vmatpush.msk.msra.mxu3 %vm113_vm2, %v842_v7 }
 0x210   :  { %v162_v12 = vpop.f32.mrf.mxu3 }
 0x211   :  { %v165_v13 = vsub.f32 %v52_v4, %v162_v12 }
 0x213   :  { %v166_v14 = vmul.f32 %v165_v13, %v165_v13 }
 0x215   :  { %649 = vmatmul.msk.f32.vlgmr.msrb.gmra.mxu1 %vm60_vm0, %v166_v14 }
 0x292   :  { %v187_v15 = vpop.f32.mrf.mxu1 }
 0x293   :  { %205 = vmatpush.msra.mxu2 %v187_v15 }
 0x294   :  { %650 = vmatmul.msk.f32.vlgmr.msra.gmra.mxu2 %vm84_vm1, %v59_v5 }
 0x317   :  { %v207_v16 = vpop.f32.mrf.mxu2 }
 0x318   :  { %v210_v17 = vmul.f32 0.032258064, %v207_v16 }
 0x31a   :  { %676 = vrsqrt.f32 %v210_v17  ;;  %vm218_vm6 = vcmp.eq.f32.partialorder %v210_v17, inf  ;;  %v221_v25 = vand.u32 2147483648, %v210_v17  ;;  %vm220_vm7 = vcmp.eq.f32.partialorder %v210_v17, 0.0 }
 0x320   :  { %v677_v18 = vpop.eup %676 }
 0x321   :  { %v212_v19 = vmul.f32 %v677_v18, %v210_v17 }
 0x323   :  { %v213_v20 = vmul.f32 %v677_v18, %v212_v19 }
 0x325   :  { %v214_v21 = vmul.f32 0.5, %v213_v20 }
 0x327   :  { %v215_v22 = vsub.f32 1.5, %v214_v21 }
 0x329   :  { %v216_v23 = vmul.f32 %v677_v18, %v215_v22  ;;  %v447_v22 = vld [vmem:[%s949_s11] sm:$0x7] }
 0x32b   :  { %v217_v24 = vmul.f32 %v216_v23, %v210_v17 }
 0x32d   :  { %v219_v26 = vsel %vm218_vm6, %v210_v17, %v217_v24  ;;  %vm380_vm6 = vcmask 1040384   ;;  %v349_v17 = vld [vmem:[%s952_s14] sm:$0x3]  ;;  %s720_s14 = smov 127  }
 0x32e   :  { %v222_v27 = vsel %vm220_vm7, %v221_v25, %v219_v26  ;;  %v358_v18 = vperm.slane %v349_v17, 0  ;;  %v365_v19 = vperm.slane %v349_v17, 1 }
 0x32f   :  { %v223_v28 = vadd.f32 1e-10, %v222_v27 }
 0x330   :  { %360 = vrot.lane.b32.xlu2 %v358_v18, %s718_s21 }
 0x331   :  { %678 = vrcp.f32 %v223_v28  ;;  %v235_v32 = vand.u32 2147483648, %v223_v28  ;;  %v233_v34 = vand.u32 2147483647, %v223_v28  ;;  %vm229_vm9 = vweird.f32 %v223_v28 }
 0x333   :  { %v236_v36 = vor.u32 1.1754944e-38, %v235_v32  ;;  %vm234_vm11 = vcmp.eq.f32.partialorder %v233_v34, 8.507059e+37  ;;  %v440_v34 = vld [vmem:[%s948_s10] sm:$0xff] }
 0x337   :  { %v679_v29 = vpop.eup %678 }
 0x338   :  { %v225_v30 = vmul.f32 %v679_v29, %v223_v28  ;;  %vm230_vm8 = vweird.f32 %v679_v29  ;;  %367 = vrot.lane.b32.xlu2 %v365_v19, %s719_s22 }
 0x339   :  { %vm231_vm10 = vmor %vm229_vm9, %vm230_vm8  ;;  %vm619_vm9 = vcmask 259072  }
 0x33a   :  { %v226_v31 = vsub.f32 1.0, %v225_v30 }
 0x33c   :  { %v227_v33 = vmul.f32 %v679_v29, %v226_v31  ;;  %v372_v31 = vld [vmem:[%s946_s8] sm:$0xf] }
 0x33e   :  { %v228_v35 = vadd.f32 %v679_v29, %v227_v33 }
 0x340   :  { %v232_v37 = vsel %vm231_vm10, %v679_v29, %v228_v35  ;;  %443 = vperm.xlu2 %675, %v440_v34   ;;  %vm625_vm10 = vcmask 261126  }
 0x341   :  { %v237_v38 = vsel %vm234_vm11, %v236_v36, %v232_v37 }
 0x342   :  { %652 = vmatmul.msk.f32.vlgmr.msra.gmra.mxu3 %vm109_vm3, %v237_v38 }
 0x38a   :  { %v361_v23 = vpop.permute.xlu2 %360 }
 0x392   :  { %v368_v24 = vpop.permute.xlu2 %367 }
 0x3c5   :  { %v260_v43 = vpop.f32.mrf.mxu3 }
 0x3c6   :  { %653 = vmatpush.msk.msrb.mxu0 %vm141_vm4, %v260_v43 }
 0x3c7   :  { %654 = vmatmul.msk.f32.vlgmr.msrb.gmra.mxu0 %vm137_vm5, %v239_v42 }
 0x444   :  { %v286_v45 = vpop.f32.mrf.mxu0 }
 0x445   :  { %v289_v46 = vmul.f32 %v286_v45, %v165_v13 }
 0x447   :  { %v296_v47 = vadd.f32 %v294_v44, %v289_v46  ;;  %v444_v46 = vpop.permute.xlu2 %443 }
 0x449   :  { %v303_v49 = vmul.f32 %v301_v48, %v296_v47 }
 0x44b   :  { %v655_v50 = vmul.f32 -1.442695, %v303_v49 }
 0x44d   :  { %680 = vpow2.f32 %v655_v50 }
 0x453   :  { %v681_v51 = vpop.eup %680 }
 0x454   :  { %v307_v52 = vadd.f32 1.0, %v681_v51 }
 0x456   :  { %682 = vrcp.f32 %v307_v52  ;;  %v319_v56 = vand.u32 2147483648, %v307_v52  ;;  %v317_v58 = vand.u32 2147483647, %v307_v52  ;;  %vm313_vm13 = vweird.f32 %v307_v52 }
 0x458   :  { %v320_v60 = vor.u32 1.1754944e-38, %v319_v56  ;;  %vm318_vm15 = vcmp.eq.f32.partialorder %v317_v58, 8.507059e+37 }
 0x45c   :  { %v683_v53 = vpop.eup %682 }
 0x45d   :  { %v309_v54 = vmul.f32 %v683_v53, %v307_v52  ;;  %vm314_vm12 = vweird.f32 %v683_v53 }
 0x45e   :  { %vm315_vm14 = vmor %vm313_vm13, %vm314_vm12 }
 0x45f   :  { %v310_v55 = vsub.f32 1.0, %v309_v54 }
 0x461   :  { %v311_v57 = vmul.f32 %v683_v53, %v310_v55 }
 0x463   :  { %v312_v59 = vadd.f32 %v683_v53, %v311_v57 }
 0x465   :  { %v316_v61 = vsel %vm315_vm14, %v683_v53, %v312_v59 }
 0x466   :  { %v321_v62 = vsel %vm318_vm15, %v320_v60, %v316_v61 }
 0x467   :  { %vm323_vm5 = vcmp.ge.f32.partialorder %v321_v62, 0.5 }
 0x468   :  { %v324_v63 = vsel %vm323_vm5, %v296_v47, 0.0 }
 0x469   :  { %v325_v4 = vsub.f32 %v296_v47, %v324_v63 }
 0x46b   :  { %v326_v5 = vrot.slane %v325_v4, 4 }
 0x46d   :  { %v327_v6 = vadd.f32 %v326_v5, %v324_v63 }
 0x46f   :  { %v329_v8 = vpack.c.bf16 %v327_v6, %v327_v6 }
 0x471   :  { %v334_v9 = vsel %vm141_vm4, %v329_v8, 0 }
 0x472   :  { %343 = vmatpush.bf16.msra.mxu1 %v334_v9 }
 0x475   :  { %656 = vmatmul.msk.bf16.vlgmr.msra.gmra.mxu1 %vm84_vm1, %v328_v10  ;;  %vm351_vm1 = vcmask 1047808  }
 0x4f2   :  { %v873_v11 = vpop.f32.mrf.mxu1 }
 0x4f3   :  { %352 = vrot.lane.b32.xlu1 %v873_v11, %s717_s4  ;;  %v350_v12 = vpack.c.bf16 %v873_v11, %v873_v11 }
 0x4f5   :  { %v401_v13 = vsel %vm380_vm6, %v350_v12, 0  ;;  %v449_v14 = vrot.slane %v350_v12, 1 }
 0x4f6   :  { %410 = vmatpush.bf16.msrb.mxu3 %v401_v13 }
 0x4f7   :  { %v454_v15 = vsel %vm380_vm6, %v449_v14, 0 }
 0x4f8   :  { %463 = vmatpush.bf16.msrb.mxu1 %v454_v15 }
 0x4f9   :  { %658 = vmatmul.msk.bf16.vlgmr.msrb.gmra.mxu3 %vm109_vm3, %v372_v31 }
 0x4fa   :  { %508 = vmatpush.msra.mxu3 %v806_v0  ;;  %v347_v16 = vpop.f32.mrf.mxu1 }
 0x4fb   :  { %660 = vmatmul.msk.bf16.vlgmr.msrb.gmra.mxu1 %vm109_vm3, %v447_v22 }
 0x4fc   :  { %509 = vmatpush.msra.mxu3 %v811_v1 }
 0x4fe   :  { %510 = vmatpush.msra.mxu3 %v817_v2 }
 0x500   :  { %511 = vmatpush.msra.mxu3 %v823_v3 }
 0x565   :  { %v353_v20 = vpop.permute.xlu1 %352 }
 0x566   :  { %v354_v21 = vsel %vm351_vm1, %v353_v20, %v873_v11 }
 0x567   :  { %355 = vrot.lane.b32.xlu1 %v354_v21, %s717_s4 }
 0x578   :  { %v897_v32 = vpop.f32.mrf.mxu1 }
 0x579   :  { %662 = vmatmul.msk.f32.vlgmr.msra.gmra.mxu3 %vm60_vm0, %v897_v32 }
 0x57c   :  { %v412_v41 = vpop.f32.mrf.mxu3 }
 0x580   :  { %v467_v33 = vpop.f32.mrf.mxu1 }
 0x584   :  { %v414_v42 = vpop.f32.mrf.mxu3 }
 0x5d9   :  { %v356_v25 = vpop.permute.xlu1 %355 }
 0x5da   :  { %v357_v26 = vsel %vm351_vm1, %v356_v25, %v873_v11 }
 0x5db   :  { %v363_v27 = vmul.f32 %v361_v23, %v357_v26  ;;  %v370_v28 = vmul.f32 %v368_v24, %v357_v26 }
 0x5dd   :  { %v364_v29 = vpack.c.bf16 %v363_v27, %v363_v27  ;;  %v371_v30 = vpack.c.bf16 %v370_v28, %v370_v28 }
 0x5df   :  { %418 = vrot.lane.b32.xlu1 %v371_v30, %s720_s14  ;;  %375 = vrot.lane.b32.xlu0 %v364_v29, %s721_s25 }
 0x5fc   :  { %v513_v50 = vpop.f32.mrf.mxu3 }
 0x5fd   :  { %v516_v51 = vmul.f32 0.0625, %v513_v50 }
 0x651   :  { %v419_v35 = vpop.permute.xlu1 %418  ;;  %v376_v36 = vpop.permute.xlu0 %375 }
 0x652   :  { %v424_v37 = vsel %vm380_vm6, %v419_v35, 0  ;;  %v382_v38 = vsel %vm380_vm6, %v376_v36, 0  ;;  %v621_v35 = vrot.slane %v873_v11, 4 }
 0x653   :  { %391 = vmatpush.bf16.msrb.mxu2 %v382_v38  ;;  %433 = vmatpush.bf16.msra.mxu0 %v424_v37 }
 0x656   :  { %657 = vmatmul.msk.bf16.vlgmr.msrb.gmra.mxu2 %vm109_vm3, %v373_v39  ;;  %659 = vmatmul.msk.bf16.vlgmr.msra.gmra.mxu0 %vm109_vm3, %v416_v40 }
 0x657   :  { %533 = vmatpush.msrb.mxu0 %v806_v0  ;;  %484 = vmatpush.msra.mxu2 %v806_v0  ;;  %v518_v0 = vrot.slane %v873_v11, 2 }
 0x659   :  { %534 = vmatpush.msrb.mxu0 %v811_v1  ;;  %485 = vmatpush.msra.mxu2 %v811_v1 }
 0x65b   :  { %535 = vmatpush.msrb.mxu0 %v817_v2  ;;  %486 = vmatpush.msra.mxu2 %v817_v2 }
 0x65d   :  { %536 = vmatpush.msrb.mxu0 %v823_v3  ;;  %487 = vmatpush.msra.mxu2 %v823_v3 }
 0x65f   :  { %664 = vmatpush.msk.msrb.mxu2 %vm113_vm2, %v842_v7  ;;  %vm545_vm2 = vcmask 1045504  }
 0x666   :  { %663 = vmatmul.msk.f32.vlgmr.msrb.gmra.mxu0 %vm60_vm0, %v518_v0 }
 0x6d3   :  { %v435_v43 = vpop.f32.mrf.mxu0 }
 0x6d9   :  { %v393_v44 = vpop.f32.mrf.mxu2 }
 0x6da   :  { %v413_v1 = vadd.f32 %v412_v41, %v393_v44 }
 0x6db   :  { %v437_v45 = vpop.f32.mrf.mxu0 }
 0x6dc   :  { %v439_v47 = vadd.f32 %v435_v43, %v413_v1 }
 0x6de   :  { %v446_v2 = vadd.f32 %v444_v46, %v439_v47 }
 0x6e0   :  { %661 = vmatmul.msk.f32.vlgmr.msra.gmra.mxu2 %vm60_vm0, %v446_v2 }
 0x6e1   :  { %v395_v48 = vpop.f32.mrf.mxu2 }
 0x6e3   :  { %v538_v3 = vpop.f32.mrf.mxu0 }
 0x6e4   :  { %v541_v49 = vmul.f32 0.0625, %v538_v3 }
 0x6e6   :  { %v543_v7 = vrot.slane %v541_v49, 2 }
 0x6e8   :  { %v546_v52 = vsel %vm545_vm2, %v516_v51, %v543_v7 }
 0x6e9   :  { %v548_v56 = vsel %vm109_vm3, %v546_v52, -inf }
 0x763   :  { %v489_v53 = vpop.f32.mrf.mxu2 }
 0x764   :  { %v492_v54 = vmul.f32 0.0625, %v489_v53 }
 0x766   :  { %v547_v55 = vsel %vm109_vm3, %v492_v54, -inf }
 0x767   :  { %v549_v57 = vmax.f32 %v547_v55, %v548_v56 }
 0x769   :  { %v550_v58 = vrot.slane %v549_v57, 4 }
 0x76b   :  { %v551_v59 = vmax.f32 %v549_v57, %v550_v58 }
 0x76d   :  { %v552_v60 = vrot.slane %v551_v59, 2 }
 0x76f   :  { %v553_v61 = vmax.f32 %v551_v59, %v552_v60 }
 0x771   :  { %v554_v62 = vrot.slane %v553_v61, 1 }
 0x773   :  { %v555_v63 = vmax.f32 %v553_v61, %v554_v62 }
 0x775   :  { %v556_v4 = vsub.f32 %v492_v54, %v555_v63  ;;  %v557_v5 = vsub.f32 %v546_v52, %v555_v63 }
 0x777   :  { %v558_v6 = vmul.f32 1.442695, %v556_v4  ;;  %v560_v8 = vmul.f32 1.442695, %v557_v5 }
 0x779   :  { %684 = vpow2.f32 %v558_v6 }
 0x77a   :  { %686 = vpow2.f32 %v560_v8 }
 0x77f   :  { %v685_v9 = vpop.eup %684 }
 0x780   :  { %v687_v10 = vpop.eup %686  ;;  %v562_v12 = vsel %vm109_vm3, %v685_v9, 0.0 }
 0x781   :  { %v563_v13 = vsel %vm109_vm3, %v687_v10, 0.0 }
 0x782   :  { %v564_v14 = vadd.f32 %v563_v13, %v562_v12 }
 0x784   :  { %v565_v15 = vrot.slane %v564_v14, 4 }
 0x786   :  { %v566_v16 = vadd.f32 %v565_v15, %v564_v14 }
 0x788   :  { %v567_v17 = vrot.slane %v566_v16, 2 }
 0x78a   :  { %v568_v18 = vadd.f32 %v567_v17, %v566_v16 }
 0x78c   :  { %v569_v19 = vrot.slane %v568_v18, 1 }
 0x78e   :  { %v570_v20 = vadd.f32 %v569_v19, %v568_v18 }
 0x790   :  { %688 = vrcp.f32 %v570_v20  ;;  %v582_v24 = vand.u32 2147483648, %v570_v20  ;;  %v580_v26 = vand.u32 2147483647, %v570_v20  ;;  %vm576_vm4 = vweird.f32 %v570_v20 }
 0x792   :  { %v583_v28 = vor.u32 1.1754944e-38, %v582_v24  ;;  %vm581_vm8 = vcmp.eq.f32.partialorder %v580_v26, 8.507059e+37 }
 0x796   :  { %v689_v21 = vpop.eup %688 }
 0x797   :  { %v572_v22 = vmul.f32 %v689_v21, %v570_v20  ;;  %vm577_vm0 = vweird.f32 %v689_v21 }
 0x798   :  { %vm578_vm7 = vmor %vm576_vm4, %vm577_vm0 }
 0x799   :  { %v573_v23 = vsub.f32 1.0, %v572_v22 }
 0x79b   :  { %v574_v25 = vmul.f32 %v689_v21, %v573_v23 }
 0x79d   :  { %v575_v27 = vadd.f32 %v689_v21, %v574_v25 }
 0x79f   :  { %v579_v29 = vsel %vm578_vm7, %v689_v21, %v575_v27 }
 0x7a0   :  { %v584_v30 = vsel %vm581_vm8, %v583_v28, %v579_v29 }
 0x7a1   :  { %v585_v31 = vmul.f32 %v685_v9, %v584_v30  ;;  %v586_v33 = vmul.f32 %v687_v10, %v584_v30 }
 0x7a3   :  { %665 = vmatmul.msk.f32.vlgmr.msrb.gmra.mxu2 %vm109_vm3, %v585_v31 }
 0x7ab   :  { %666 = vmatmul.msk.f32.gmra.mxu2 %vm109_vm3, %v586_v33 }
 0x826   :  { %v610_v34 = vpop.f32.mrf.mxu2 }
 0x827   :  { %v616_v37 = vmul.f32 %v610_v34, %v446_v2 }
 0x82e   :  { %v613_v36 = vpop.f32.mrf.mxu2 }
 0x82f   :  { %v617_v38 = vmul.f32 %v613_v36, %v897_v32  ;;  %v623_v39 = vmul.f32 %v621_v35, %v613_v36 }
 0x831   :  { %v618_v40 = vadd.f32 %v617_v38, %v616_v37  ;;  %v624_v0 = vadd.f32 %v623_v39, %v616_v37 }
 0x833   :  { %620 = vst.msk [vmem:[#allocation2] sm:$0x3f] %vm619_vm9, %v618_v40 }
 0x834   :  { %626 = vst.msk [vmem:[#allocation2] sm:$0xc0] %vm625_vm10, %v624_v0 }
 0x835   :  { %637 = dma.vmem_to_hbm [thread:$0]  %s633_s9, 128, %s635_s30, [#allocation3]  }
 0x836   :  { %714 = dma.done.wait [#allocation3], 128  }
 0x837   :  { %715 = vsyncadd [#allocation3], 4294967168 }
 0x838   :  { %642 = vsyncpa [#allocation3], 1 }

// kernel: tpu_custom_call.1
= control target key start
LH: loop header
LB: loop body
LE: loop exit
PB: predicated region body
PF: predicated region fallthrough
CT: control target
= control target key end

     0   :  { %s938_s0 = inlined_call_operand.vmem [shape: f32[8,32], index: 0, kind: input, shape index: {}]   ;;  %s939_s1 = inlined_call_operand.vmem [shape: f32[8,1], index: 1, kind: input, shape index: {}]   ;;  %s940_s2 = inlined_call_operand.vmem [shape: f32[8,1], index: 2, kind: input, shape index: {}]   ;;  %s941_s3 = inlined_call_operand.vmem [shape: f32[8,4], index: 3, kind: input, shape index: {}]   ;;  %s942_s4 = inlined_call_operand.vmem [shape: f32[8,4], index: 4, kind: input, shape index: {}]   ;;  %s943_s5 = inlined_call_operand.vmem [shape: f32[4,8], index: 5, kind: input, shape index: {}]   ;;  %s944_s6 = inlined_call_operand.vmem [shape: bf16[4,8], index: 6, kind: input, shape index: {}]   ;;  %s945_s7 = inlined_call_operand.vmem [shape: bf16[8,2], index: 7, kind: input, shape index: {}]   ;;  %s946_s8 = inlined_call_operand.vmem [shape: bf16[8,2], index: 8, kind: input, shape index: {}]   ;;  %s947_s9 = inlined_call_operand.vmem [shape: bf16[8,2], index: 9, kind: input, shape index: {}]   ;;  %s948_s10 = inlined_call_operand.vmem [shape: f32[8,1], index: 10, kind: input, shape index: {}]   ;;  %s949_s11 = inlined_call_operand.vmem [shape: bf16[6,2], index: 11, kind: input, shape index: {}]   ;;  %s950_s12 = inlined_call_operand.vmem [shape: f32[32,2], index: 12, kind: input, shape index: {}]   ;;  %s951_s13 = inlined_call_operand.vmem [shape: f32[2,32], index: 13, kind: input, shape index: {}]   ;;  %s952_s14 = inlined_call_operand.vmem [shape: f32[2,32], index: 14, kind: input, shape index: {}]   ;;  %s953_s15 = inlined_call_operand.hbm [shape: f32[8,32], index: 15, kind: output, shape index: {}]  }
   0x1   :  { %v806_v0 = vld [vmem:[%s950_s12 + $0x18] sm:$0xff]  ;;  %v811_v1 = vld [vmem:[%s950_s12 + $0x10] sm:$0xff] }
   0x2   :  { %76 = vmatpush.msra.mxu0 %v806_v0 }
   0x3   :  { %20 = vsyncpa [#allocation3], 0  ;;  %v817_v2 = vld [vmem:[%s950_s12 + $0x8] sm:$0xff]  ;;  %v823_v3 = vld [vmem:[%s950_s12] sm:$0xff]  ;;  %vm60_vm0 = vcmask 261120   ;;  %vm84_vm1 = vcmask 64512  }
   0x4   :  { %77 = vmatpush.msra.mxu0 %v811_v1  ;;  %v52_v4 = vld [vmem:[%s938_s0] sm:$0xff]  ;;  %vm113_vm2 = vcmask 1041408   ;;  %vm109_vm3 = vcmask 15360   ;;  %vm141_vm4 = vcmask 1043456   ;;  %vm137_vm5 = vcmask 31744   ;;  %s718_s21 = smov 31  }
   0x5   :  { %v59_v5 = vld [vmem:[%s943_s5] sm:$0xf]  ;;  %v716_v39 = vmov 0   ;;  %s719_s22 = smov 1   ;;  %s721_s25 = smov 97  }
   0x6   :  { %78 = vmatpush.msra.mxu0 %v817_v2  ;;  %v842_v7 = vld [vmem:[%s951_s13] sm:$0x3]  ;;  %674 = vset.pattern.permute.xlu0 %v716_v39  ;;  %s634_s30 = sshll.u32 %s953_s15, 4  ;;  %s635_s30 = int_to_ptr.hbm [resolvable:$true] %s634_s30 }
   0x7   :  { %645 = vmatpush.msk.msra.mxu3 %vm113_vm2, %v842_v7  ;;  %v58_v10 = vld [vmem:[%s941_s3] sm:$0xff]  ;;  %675 = vset.pattern.permute.xlu2 %v716_v39 }
   0x8   :  { %79 = vmatpush.msra.mxu0 %v823_v3  ;;  %v290_v40 = vld [vmem:[%s939_s1] sm:$0xff] }
   0x9   :  { %643 = vmatmul.msk.f32.vlgmr.msra.gmra.mxu0 %vm60_vm0, %v52_v4  ;;  %293 = vperm.xlu0 %674, %v290_v40   ;;  %v297_v41 = vld [vmem:[%s940_s2] sm:$0xff] }
   0xa   :  { %v239_v42 = vld [vmem:[%s942_s4] sm:$0xff]  ;;  %s717_s4 = smov 32  }
   0xb   :  { %v373_v39 = vld [vmem:[%s945_s7] sm:$0xf]  ;;  %s722_s7 = smov [#allocation2]  }
   0xc   :  { %v416_v40 = vld [vmem:[%s947_s9] sm:$0xf]  ;;  %s632_s9 = sshll.u32 %s722_s7, 4  ;;  %s633_s9 = int_to_ptr.vmem [resolvable:$true] %s632_s9 }
  0x11   :  { %300 = vperm.xlu0 %674, %v297_v41  }
  0x7b   :  { %v294_v44 = vpop.permute.xlu0 %293 }
  0x83   :  { %v301_v48 = vpop.permute.xlu0 %300 }
  0x86   :  { %v81_v6 = vpop.f32.mrf.mxu0 }
  0x87   :  { %103 = vmatpush.msra.mxu1 %v81_v6 }
  0x88   :  { %644 = vmatmul.msk.f32.vlgmr.msra.gmra.mxu1 %vm84_vm1, %v59_v5 }
  0x89   :  { %182 = vmatpush.msrb.mxu1 %v806_v0 }
  0x8b   :  { %183 = vmatpush.msrb.mxu1 %v811_v1 }
  0x8d   :  { %184 = vmatpush.msrb.mxu1 %v817_v2 }
  0x8f   :  { %185 = vmatpush.msrb.mxu1 %v823_v3 }
 0x105   :  { %v105_v8 = vpop.f32.mrf.mxu1 }
 0x106   :  { %v108_v9 = vmul.f32 0.03125, %v105_v8 }
 0x108   :  { %646 = vmatmul.msk.f32.vlgmr.msra.gmra.mxu3 %vm109_vm3, %v108_v9 }
 0x18b   :  { %v134_v11 = vpop.f32.mrf.mxu3 }
 0x18c   :  { %647 = vmatpush.msk.msrb.mxu3 %vm141_vm4, %v134_v11 }
 0x18d   :  { %648 = vmatmul.msk.f32.vlgmr.msrb.gmra.mxu3 %vm137_vm5, %v58_v10  ;;  %v328_v10 = vld [vmem:[%s944_s6] sm:$0x3] }
 0x18e   :  { %651 = vmatpush.msk.msra.mxu3 %vm113_vm2, %v842_v7 }
 0x210   :  { %v162_v12 = vpop.f32.mrf.mxu3 }
 0x211   :  { %v165_v13 = vsub.f32 %v52_v4, %v162_v12 }
 0x213   :  { %v166_v14 = vmul.f32 %v165_v13, %v165_v13 }
 0x215   :  { %649 = vmatmul.msk.f32.vlgmr.msrb.gmra.mxu1 %vm60_vm0, %v166_v14 }
 0x292   :  { %v187_v15 = vpop.f32.mrf.mxu1 }
 0x293   :  { %205 = vmatpush.msra.mxu2 %v187_v15 }
 0x294   :  { %650 = vmatmul.msk.f32.vlgmr.msra.gmra.mxu2 %vm84_vm1, %v59_v5 }
 0x317   :  { %v207_v16 = vpop.f32.mrf.mxu2 }
 0x318   :  { %v210_v17 = vmul.f32 0.032258064, %v207_v16 }
 0x31a   :  { %676 = vrsqrt.f32 %v210_v17  ;;  %vm218_vm6 = vcmp.eq.f32.partialorder %v210_v17, inf  ;;  %v221_v25 = vand.u32 2147483648, %v210_v17  ;;  %vm220_vm7 = vcmp.eq.f32.partialorder %v210_v17, 0.0 }
 0x320   :  { %v677_v18 = vpop.eup %676 }
 0x321   :  { %v212_v19 = vmul.f32 %v677_v18, %v210_v17 }
 0x323   :  { %v213_v20 = vmul.f32 %v677_v18, %v212_v19 }
 0x325   :  { %v214_v21 = vmul.f32 0.5, %v213_v20 }
 0x327   :  { %v215_v22 = vsub.f32 1.5, %v214_v21 }
 0x329   :  { %v216_v23 = vmul.f32 %v677_v18, %v215_v22  ;;  %v447_v22 = vld [vmem:[%s949_s11] sm:$0x7] }
 0x32b   :  { %v217_v24 = vmul.f32 %v216_v23, %v210_v17 }
 0x32d   :  { %v219_v26 = vsel %vm218_vm6, %v210_v17, %v217_v24  ;;  %vm380_vm6 = vcmask 1040384   ;;  %v349_v17 = vld [vmem:[%s952_s14] sm:$0x3]  ;;  %s720_s14 = smov 127  }
 0x32e   :  { %v222_v27 = vsel %vm220_vm7, %v221_v25, %v219_v26  ;;  %v358_v18 = vperm.slane %v349_v17, 0  ;;  %v365_v19 = vperm.slane %v349_v17, 1 }
 0x32f   :  { %v223_v28 = vadd.f32 1e-10, %v222_v27 }
 0x330   :  { %360 = vrot.lane.b32.xlu2 %v358_v18, %s718_s21 }
 0x331   :  { %678 = vrcp.f32 %v223_v28  ;;  %v235_v32 = vand.u32 2147483648, %v223_v28  ;;  %v233_v34 = vand.u32 2147483647, %v223_v28  ;;  %vm229_vm9 = vweird.f32 %v223_v28 }
 0x333   :  { %v236_v36 = vor.u32 1.1754944e-38, %v235_v32  ;;  %vm234_vm11 = vcmp.eq.f32.partialorder %v233_v34, 8.507059e+37  ;;  %v440_v34 = vld [vmem:[%s948_s10] sm:$0xff] }
 0x337   :  { %v679_v29 = vpop.eup %678 }
 0x338   :  { %v225_v30 = vmul.f32 %v679_v29, %v223_v28  ;;  %vm230_vm8 = vweird.f32 %v679_v29  ;;  %367 = vrot.lane.b32.xlu2 %v365_v19, %s719_s22 }
 0x339   :  { %vm231_vm10 = vmor %vm229_vm9, %vm230_vm8  ;;  %vm619_vm9 = vcmask 259072  }
 0x33a   :  { %v226_v31 = vsub.f32 1.0, %v225_v30 }
 0x33c   :  { %v227_v33 = vmul.f32 %v679_v29, %v226_v31  ;;  %v372_v31 = vld [vmem:[%s946_s8] sm:$0xf] }
 0x33e   :  { %v228_v35 = vadd.f32 %v679_v29, %v227_v33 }
 0x340   :  { %v232_v37 = vsel %vm231_vm10, %v679_v29, %v228_v35  ;;  %443 = vperm.xlu2 %675, %v440_v34   ;;  %vm625_vm10 = vcmask 261126  }
 0x341   :  { %v237_v38 = vsel %vm234_vm11, %v236_v36, %v232_v37 }
 0x342   :  { %652 = vmatmul.msk.f32.vlgmr.msra.gmra.mxu3 %vm109_vm3, %v237_v38 }
 0x38a   :  { %v361_v23 = vpop.permute.xlu2 %360 }
 0x392   :  { %v368_v24 = vpop.permute.xlu2 %367 }
 0x3c5   :  { %v260_v43 = vpop.f32.mrf.mxu3 }
 0x3c6   :  { %653 = vmatpush.msk.msrb.mxu0 %vm141_vm4, %v260_v43 }
 0x3c7   :  { %654 = vmatmul.msk.f32.vlgmr.msrb.gmra.mxu0 %vm137_vm5, %v239_v42 }
 0x444   :  { %v286_v45 = vpop.f32.mrf.mxu0 }
 0x445   :  { %v289_v46 = vmul.f32 %v286_v45, %v165_v13 }
 0x447   :  { %v296_v47 = vadd.f32 %v294_v44, %v289_v46  ;;  %v444_v46 = vpop.permute.xlu2 %443 }
 0x449   :  { %v303_v49 = vmul.f32 %v301_v48, %v296_v47 }
 0x44b   :  { %v655_v50 = vmul.f32 -1.442695, %v303_v49 }
 0x44d   :  { %680 = vpow2.f32 %v655_v50 }
 0x453   :  { %v681_v51 = vpop.eup %680 }
 0x454   :  { %v307_v52 = vadd.f32 1.0, %v681_v51 }
 0x456   :  { %682 = vrcp.f32 %v307_v52  ;;  %v319_v56 = vand.u32 2147483648, %v307_v52  ;;  %v317_v58 = vand.u32 2147483647, %v307_v52  ;;  %vm313_vm13 = vweird.f32 %v307_v52 }
 0x458   :  { %v320_v60 = vor.u32 1.1754944e-38, %v319_v56  ;;  %vm318_vm15 = vcmp.eq.f32.partialorder %v317_v58, 8.507059e+37 }
 0x45c   :  { %v683_v53 = vpop.eup %682 }
 0x45d   :  { %v309_v54 = vmul.f32 %v683_v53, %v307_v52  ;;  %vm314_vm12 = vweird.f32 %v683_v53 }
 0x45e   :  { %vm315_vm14 = vmor %vm313_vm13, %vm314_vm12 }
 0x45f   :  { %v310_v55 = vsub.f32 1.0, %v309_v54 }
 0x461   :  { %v311_v57 = vmul.f32 %v683_v53, %v310_v55 }
 0x463   :  { %v312_v59 = vadd.f32 %v683_v53, %v311_v57 }
 0x465   :  { %v316_v61 = vsel %vm315_vm14, %v683_v53, %v312_v59 }
 0x466   :  { %v321_v62 = vsel %vm318_vm15, %v320_v60, %v316_v61 }
 0x467   :  { %vm323_vm5 = vcmp.ge.f32.partialorder %v321_v62, 0.5 }
 0x468   :  { %v324_v63 = vsel %vm323_vm5, %v296_v47, 0.0 }
 0x469   :  { %v325_v4 = vsub.f32 %v296_v47, %v324_v63 }
 0x46b   :  { %v326_v5 = vrot.slane %v325_v4, 4 }
 0x46d   :  { %v327_v6 = vadd.f32 %v326_v5, %v324_v63 }
 0x46f   :  { %v329_v8 = vpack.c.bf16 %v327_v6, %v327_v6 }
 0x471   :  { %v334_v9 = vsel %vm141_vm4, %v329_v8, 0 }
 0x472   :  { %343 = vmatpush.bf16.msra.mxu1 %v334_v9 }
 0x475   :  { %656 = vmatmul.msk.bf16.vlgmr.msra.gmra.mxu1 %vm84_vm1, %v328_v10  ;;  %vm351_vm1 = vcmask 1047808  }
 0x4f2   :  { %v873_v11 = vpop.f32.mrf.mxu1 }
 0x4f3   :  { %352 = vrot.lane.b32.xlu1 %v873_v11, %s717_s4  ;;  %v350_v12 = vpack.c.bf16 %v873_v11, %v873_v11 }
 0x4f5   :  { %v401_v13 = vsel %vm380_vm6, %v350_v12, 0  ;;  %v449_v14 = vrot.slane %v350_v12, 1 }
 0x4f6   :  { %410 = vmatpush.bf16.msrb.mxu3 %v401_v13 }
 0x4f7   :  { %v454_v15 = vsel %vm380_vm6, %v449_v14, 0 }
 0x4f8   :  { %463 = vmatpush.bf16.msrb.mxu1 %v454_v15 }
 0x4f9   :  { %658 = vmatmul.msk.bf16.vlgmr.msrb.gmra.mxu3 %vm109_vm3, %v372_v31 }
 0x4fa   :  { %508 = vmatpush.msra.mxu3 %v806_v0  ;;  %v347_v16 = vpop.f32.mrf.mxu1 }
 0x4fb   :  { %660 = vmatmul.msk.bf16.vlgmr.msrb.gmra.mxu1 %vm109_vm3, %v447_v22 }
 0x4fc   :  { %509 = vmatpush.msra.mxu3 %v811_v1 }
 0x4fe   :  { %510 = vmatpush.msra.mxu3 %v817_v2 }
 0x500   :  { %511 = vmatpush.msra.mxu3 %v823_v3 }
 0x565   :  { %v353_v20 = vpop.permute.xlu1 %352 }
 0x566   :  { %v354_v21 = vsel %vm351_vm1, %v353_v20, %v873_v11 }
 0x567   :  { %355 = vrot.lane.b32.xlu1 %v354_v21, %s717_s4 }
 0x578   :  { %v897_v32 = vpop.f32.mrf.mxu1 }
 0x579   :  { %662 = vmatmul.msk.f32.vlgmr.msra.gmra.mxu3 %vm60_vm0, %v897_v32 }
 0x57c   :  { %v412_v41 = vpop.f32.mrf.mxu3 }
 0x580   :  { %v467_v33 = vpop.f32.mrf.mxu1 }
 0x584   :  { %v414_v42 = vpop.f32.mrf.mxu3 }
 0x5d9   :  { %v356_v25 = vpop.permute.xlu1 %355 }
 0x5da   :  { %v357_v26 = vsel %vm351_vm1, %v356_v25, %v873_v11 }
 0x5db   :  { %v363_v27 = vmul.f32 %v361_v23, %v357_v26  ;;  %v370_v28 = vmul.f32 %v368_v24, %v357_v26 }
 0x5dd   :  { %v364_v29 = vpack.c.bf16 %v363_v27, %v363_v27  ;;  %v371_v30 = vpack.c.bf16 %v370_v28, %v370_v28 }
 0x5df   :  { %418 = vrot.lane.b32.xlu1 %v371_v30, %s720_s14  ;;  %375 = vrot.lane.b32.xlu0 %v364_v29, %s721_s25 }
 0x5fc   :  { %v513_v50 = vpop.f32.mrf.mxu3 }
 0x5fd   :  { %v516_v51 = vmul.f32 0.0625, %v513_v50 }
 0x651   :  { %v419_v35 = vpop.permute.xlu1 %418  ;;  %v376_v36 = vpop.permute.xlu0 %375 }
 0x652   :  { %v424_v37 = vsel %vm380_vm6, %v419_v35, 0  ;;  %v382_v38 = vsel %vm380_vm6, %v376_v36, 0  ;;  %v621_v35 = vrot.slane %v873_v11, 4 }
 0x653   :  { %391 = vmatpush.bf16.msrb.mxu2 %v382_v38  ;;  %433 = vmatpush.bf16.msra.mxu0 %v424_v37 }
 0x656   :  { %657 = vmatmul.msk.bf16.vlgmr.msrb.gmra.mxu2 %vm109_vm3, %v373_v39  ;;  %659 = vmatmul.msk.bf16.vlgmr.msra.gmra.mxu0 %vm109_vm3, %v416_v40 }
 0x657   :  { %533 = vmatpush.msrb.mxu0 %v806_v0  ;;  %484 = vmatpush.msra.mxu2 %v806_v0  ;;  %v518_v0 = vrot.slane %v873_v11, 2 }
 0x659   :  { %534 = vmatpush.msrb.mxu0 %v811_v1  ;;  %485 = vmatpush.msra.mxu2 %v811_v1 }
 0x65b   :  { %535 = vmatpush.msrb.mxu0 %v817_v2  ;;  %486 = vmatpush.msra.mxu2 %v817_v2 }
 0x65d   :  { %536 = vmatpush.msrb.mxu0 %v823_v3  ;;  %487 = vmatpush.msra.mxu2 %v823_v3 }
 0x65f   :  { %664 = vmatpush.msk.msrb.mxu2 %vm113_vm2, %v842_v7  ;;  %vm545_vm2 = vcmask 1045504  }
 0x666   :  { %663 = vmatmul.msk.f32.vlgmr.msrb.gmra.mxu0 %vm60_vm0, %v518_v0 }
 0x6d3   :  { %v435_v43 = vpop.f32.mrf.mxu0 }
 0x6d9   :  { %v393_v44 = vpop.f32.mrf.mxu2 }
 0x6da   :  { %v413_v1 = vadd.f32 %v412_v41, %v393_v44 }
 0x6db   :  { %v437_v45 = vpop.f32.mrf.mxu0 }
 0x6dc   :  { %v439_v47 = vadd.f32 %v435_v43, %v413_v1 }
 0x6de   :  { %v446_v2 = vadd.f32 %v444_v46, %v439_v47 }
 0x6e0   :  { %661 = vmatmul.msk.f32.vlgmr.msra.gmra.mxu2 %vm60_vm0, %v446_v2 }
 0x6e1   :  { %v395_v48 = vpop.f32.mrf.mxu2 }
 0x6e3   :  { %v538_v3 = vpop.f32.mrf.mxu0 }
 0x6e4   :  { %v541_v49 = vmul.f32 0.0625, %v538_v3 }
 0x6e6   :  { %v543_v7 = vrot.slane %v541_v49, 2 }
 0x6e8   :  { %v546_v52 = vsel %vm545_vm2, %v516_v51, %v543_v7 }
 0x6e9   :  { %v548_v56 = vsel %vm109_vm3, %v546_v52, -inf }
 0x763   :  { %v489_v53 = vpop.f32.mrf.mxu2 }
 0x764   :  { %v492_v54 = vmul.f32 0.0625, %v489_v53 }
 0x766   :  { %v547_v55 = vsel %vm109_vm3, %v492_v54, -inf }
 0x767   :  { %v549_v57 = vmax.f32 %v547_v55, %v548_v56 }
 0x769   :  { %v550_v58 = vrot.slane %v549_v57, 4 }
 0x76b   :  { %v551_v59 = vmax.f32 %v549_v57, %v550_v58 }
 0x76d   :  { %v552_v60 = vrot.slane %v551_v59, 2 }
 0x76f   :  { %v553_v61 = vmax.f32 %v551_v59, %v552_v60 }
 0x771   :  { %v554_v62 = vrot.slane %v553_v61, 1 }
 0x773   :  { %v555_v63 = vmax.f32 %v553_v61, %v554_v62 }
 0x775   :  { %v556_v4 = vsub.f32 %v492_v54, %v555_v63  ;;  %v557_v5 = vsub.f32 %v546_v52, %v555_v63 }
 0x777   :  { %v558_v6 = vmul.f32 1.442695, %v556_v4  ;;  %v560_v8 = vmul.f32 1.442695, %v557_v5 }
 0x779   :  { %684 = vpow2.f32 %v558_v6 }
 0x77a   :  { %686 = vpow2.f32 %v560_v8 }
 0x77f   :  { %v685_v9 = vpop.eup %684 }
 0x780   :  { %v687_v10 = vpop.eup %686  ;;  %v562_v12 = vsel %vm109_vm3, %v685_v9, 0.0 }
 0x781   :  { %v563_v13 = vsel %vm109_vm3, %v687_v10, 0.0 }
 0x782   :  { %v564_v14 = vadd.f32 %v563_v13, %v562_v12 }
 0x784   :  { %v565_v15 = vrot.slane %v564_v14, 4 }
 0x786   :  { %v566_v16 = vadd.f32 %v565_v15, %v564_v14 }
 0x788   :  { %v567_v17 = vrot.slane %v566_v16, 2 }
 0x78a   :  { %v568_v18 = vadd.f32 %v567_v17, %v566_v16 }
 0x78c   :  { %v569_v19 = vrot.slane %v568_v18, 1 }
 0x78e   :  { %v570_v20 = vadd.f32 %v569_v19, %v568_v18 }
 0x790   :  { %688 = vrcp.f32 %v570_v20  ;;  %v582_v24 = vand.u32 2147483648, %v570_v20  ;;  %v580_v26 = vand.u32 2147483647, %v570_v20  ;;  %vm576_vm4 = vweird.f32 %v570_v20 }
 0x792   :  { %v583_v28 = vor.u32 1.1754944e-38, %v582_v24  ;;  %vm581_vm8 = vcmp.eq.f32.partialorder %v580_v26, 8.507059e+37 }
 0x796   :  { %v689_v21 = vpop.eup %688 }
 0x797   :  { %v572_v22 = vmul.f32 %v689_v21, %v570_v20  ;;  %vm577_vm0 = vweird.f32 %v689_v21 }
 0x798   :  { %vm578_vm7 = vmor %vm576_vm4, %vm577_vm0 }
 0x799   :  { %v573_v23 = vsub.f32 1.0, %v572_v22 }
 0x79b   :  { %v574_v25 = vmul.f32 %v689_v21, %v573_v23 }
 0x79d   :  { %v575_v27 = vadd.f32 %v689_v21, %v574_v25 }
 0x79f   :  { %v579_v29 = vsel %vm578_vm7, %v689_v21, %v575_v27 }
 0x7a0   :  { %v584_v30 = vsel %vm581_vm8, %v583_v28, %v579_v29 }
 0x7a1   :  { %v585_v31 = vmul.f32 %v685_v9, %v584_v30  ;;  %v586_v33 = vmul.f32 %v687_v10, %v584_v30 }
 0x7a3   :  { %665 = vmatmul.msk.f32.vlgmr.msrb.gmra.mxu2 %vm109_vm3, %v585_v31 }
 0x7ab   :  { %666 = vmatmul.msk.f32.gmra.mxu2 %vm109_vm3, %v586_v33 }
 0x826   :  { %v610_v34 = vpop.f32.mrf.mxu2 }
 0x827   :  { %v616_v37 = vmul.f32 %v610_v34, %v446_v2 }
 0x82e   :  { %v613_v36 = vpop.f32.mrf.mxu2 }
 0x82f   :  { %v617_v38 = vmul.f32 %v613_v36, %v897_v32  ;;  %v623_v39 = vmul.f32 %v621_v35, %v613_v36 }
 0x831   :  { %v618_v40 = vadd.f32 %v617_v38, %v616_v37  ;;  %v624_v0 = vadd.f32 %v623_v39, %v616_v37 }
 0x833   :  { %620 = vst.msk [vmem:[#allocation2] sm:$0x3f] %vm619_vm9, %v618_v40 }
 0x834   :  { %626 = vst.msk [vmem:[#allocation2] sm:$0xc0] %vm625_vm10, %v624_v0 }
 0x835   :  { %637 = dma.vmem_to_hbm [thread:$0]  %s633_s9, 128, %s635_s30, [#allocation3]  }
 0x836   :  { %714 = dma.done.wait [#allocation3], 128  }
 0x837   :  { %715 = vsyncadd [#allocation3], 4294967168 }
 0x838   :  { %642 = vsyncpa [#allocation3], 1 }

</bundles_post_ra>
